<compile_context>
chip_gen: v5e
topology: v5e:2x2
jax: 0.10.0
libtpu: 0.0.40
codegen_flags: <defaults>
</compile_context>

<pallas_src>
import functools

import jax
import jax.numpy as jnp
from jax.experimental import pallas as pl
from jax.experimental.pallas import tpu as pltpu


def _head_kernel(x_ref, zt_ref, wbd_ref, b_ref, o_ref, xpad_ref, *,
                 C, H, W, zh, zw, oh, ow, pad):
    """One grid step = one batch element, fully lane-dense.

    x_ref   : (1, H, W*C)        un-padded search features, (w, c) fused on lanes
    zt_ref  : (1, zh*zw, ow*C)   depthwise weights, one pre-tiled row per tap
    wbd_ref : (ow*C, ow*O)       block-diag proj_2 weight kron(I_ow, w)*out_scale
    b_ref   : (1, ow*O)          bias * out_scale, tiled over ow
    o_ref   : (1, oh, ow*O)      output slab
    xpad_ref: (H+2p, (W+2p)*C)   VMEM scratch holding the zero-padded search slab
    """
    # Zero-pad inside the kernel (scratch is tiny: (20, 160) f32 ~ 13 KB).
    xpad_ref[...] = jnp.zeros_like(xpad_ref)
    xpad_ref[pl.ds(pad, H), pl.ds(pad * C, W * C)] = x_ref[0]

    # Depthwise cross-correlation as shift-and-MAC on full (oh, ow*C) tiles:
    #   acc[i, j*C + c] = sum_{u,v} x_pad[i+u, (j+v)*C + c] * z[u, v, c]
    # One sublane realign per u (5), one lane-shifted slice per tap (25); the
    # MAC itself runs on 100%-occupied 128-lane vregs.
    acc = jnp.zeros((oh, ow * C), jnp.float32)
    for u in range(zh):
        slab = xpad_ref[pl.ds(u, oh), :]                 # (oh, Wp*C)
        for v in range(zw):
            patch = slab[:, v * C:v * C + ow * C]        # (oh, ow*C), lane-dense
            zrow = zt_ref[0, pl.ds(u * zw + v, 1), :]    # (1, ow*C), no re-broadcast
            acc = acc + patch * zrow

    # proj_2 + bias + out_scale: one MXU matmul with a block-diagonal weight,
    # mapping (j, c) lanes -> (j, o) lanes directly (no reshape, K=N=128).
    y = jnp.dot(acc, wbd_ref[...], preferred_element_type=jnp.float32)
    o_ref[0] = (y + b_ref[0, :]).astype(o_ref.dtype)


def siamfc_head_depwise(z, x, w_proj, b_proj, out_scale=0.001):
    """z: (B, C, zh, zw), x: (B, C, H, W) in NCHW. Returns (B, O, oh, ow) NCHW."""
    B, C, zh, zw = z.shape
    _, _, H, W = x.shape
    p = zh // 2
    oh = H + 2 * p - zh + 1
    ow = W + 2 * p - zw + 1
    O = w_proj.shape[1]
    Hp, Wp = H + 2 * p, W + 2 * p
    f32 = jnp.float32

    # Layout plumbing at the boundary (tiny arrays, single XLA passes):
    # search features as (B, H, W*C) lane-dense slabs.
    x2d = jnp.transpose(x, (0, 2, 3, 1)).reshape(B, H, W * C).astype(f32)
    # Depthwise weights: one (ow*C,) row per tap (u, v), tiled over ow so the
    # kernel never broadcasts an 8-wide channel vector.
    z_taps = jnp.transpose(z, (0, 2, 3, 1)).reshape(B, zh * zw, C).astype(f32)
    zt = jnp.tile(z_taps[:, :, None, :], (1, 1, ow, 1)).reshape(B, zh * zw, ow * C)
    # proj_2 as a block-diagonal (ow*C, ow*O) matrix; out_scale folded into both
    # the weight and the bias (so the kernel does no extra scale pass).
    wbd = jnp.kron(jnp.eye(ow, dtype=f32), w_proj.astype(f32)) * out_scale
    brow = (jnp.tile(b_proj.astype(f32), ow) * out_scale).reshape(1, ow * O)

    kernel = functools.partial(_head_kernel, C=C, H=H, W=W, zh=zh, zw=zw,
                               oh=oh, ow=ow, pad=p)

    out2d = pl.pallas_call(
        kernel,
        out_shape=jax.ShapeDtypeStruct((B, oh, ow * O), f32),
        grid_spec=pltpu.PrefetchScalarGridSpec(
            num_scalar_prefetch=0,
            grid=(B,),
            in_specs=[
                pl.BlockSpec((1, H, W * C), lambda b: (b, 0, 0)),
                pl.BlockSpec((1, zh * zw, ow * C), lambda b: (b, 0, 0)),
                pl.BlockSpec((ow * C, ow * O), lambda b: (0, 0)),
                pl.BlockSpec((1, ow * O), lambda b: (0, 0)),
            ],
            out_specs=pl.BlockSpec((1, oh, ow * O), lambda b: (b, 0, 0)),
            scratch_shapes=[pltpu.VMEM((Hp, Wp * C), f32)],
        ),
        compiler_params=pltpu.CompilerParams(
            dimension_semantics=("parallel",)),
    )(x2d, zt, wbd, brow)

    # (B, oh, ow*O) -> (B, O, oh, ow) to match the PyTorch NCHW convention.
    return jnp.transpose(out2d.reshape(B, oh, ow, O), (0, 3, 1, 2))


def _reference(z, x, w_proj, b_proj, out_scale):
    """Pure-JAX reference mirroring the PyTorch code (F.conv2d with groups)."""
    B, C, zh, zw = z.shape
    _, _, H, W = x.shape
    p = zh // 2
    search = x.reshape(1, B * C, H, W)
    kern = z.reshape(B * C, 1, zh, zw)
    out = jax.lax.conv_general_dilated(
        search, kern, window_strides=(1, 1), padding=[(p, p), (p, p)],
        feature_group_count=B * C)
    out = out.reshape(B, C, out.shape[2], out.shape[3])
    proj = jnp.einsum('bchw,co->bohw', out, w_proj) + b_proj[None, :, None, None]
    return proj * out_scale


if __name__ == "__main__":
    B, C, O = 2, 8, 8          # batch, in_channels, out_channels
    zh = zw = 5                # exemplar spatial size (xcorr kernel)
    H = W = 16                 # search spatial size -> ow*C = ow*O = 128 lanes
    out_scale = 0.001

    key = jax.random.PRNGKey(0)
    kz, kx, kw, kb = jax.random.split(key, 4)
    z = jax.random.normal(kz, (B, C, zh, zw), dtype=jnp.float32)
    x = jax.random.normal(kx, (B, C, H, W), dtype=jnp.float32)
    # Deterministic proj_2 parameters (assumed 1x1 conv C -> O, with bias).
    w_proj = jax.random.normal(kw, (C, O), dtype=jnp.float32) * 0.1
    b_proj = jax.random.normal(kb, (O,), dtype=jnp.float32) * 0.1

    fwd = jax.jit(siamfc_head_depwise, static_argnums=(4,))
    out = jax.block_until_ready(fwd(z, x, w_proj, b_proj, out_scale))

    ref = jax.block_until_ready(_reference(z, x, w_proj, b_proj, out_scale))
    assert out.shape == (B, O, H, W), out.shape
    assert jnp.allclose(out, ref, rtol=2e-4, atol=2e-5), \
        f"max abs err = {jnp.max(jnp.abs(out - ref))}"

    print("KERNEL_OK")
</pallas_src>

<mosaic_0001>
module attributes {stable_mosaic.version = 11 : i64} {
  func.func @_head_kernel(%arg0: i32, %arg1: memref<1x16x128xf32, #tpu.memory_space<vmem>>, %arg2: memref<1x25x128xf32, #tpu.memory_space<vmem>>, %arg3: memref<128x128xf32, #tpu.memory_space<vmem>>, %arg4: memref<1x128xf32, #tpu.memory_space<vmem>>, %arg5: memref<1x16x128xf32, #tpu.memory_space<vmem>>, %arg6: memref<20x160xf32, #tpu.memory_space<vmem>>) attributes {dimension_semantics = [#tpu.dimension_semantics<parallel>], iteration_bounds = array<i64: 2>, scalar_prefetch = 0 : i64, scratch_operands = 1 : i64, tpu.core_type = #tpu.core_type<tc>, window_params = [{transform_indices = @transform_0, window_bounds = array<i64: 1, 16, 128>}, {transform_indices = @transform_1, window_bounds = array<i64: 1, 25, 128>}, {pipeline_mode = #tpu.pipeline_mode<synchronous>, transform_indices = @transform_2, window_bounds = array<i64: 128, 128>}, {pipeline_mode = #tpu.pipeline_mode<synchronous>, transform_indices = @transform_3, window_bounds = array<i64: 1, 128>}, {transform_indices = @transform_4, window_bounds = array<i64: 1, 16, 128>}]} {
    %cst = arith.constant 0.000000e+00 : f32
    %0 = vector.broadcast %cst : f32 to vector<20x160xf32>
    %c0 = arith.constant 0 : index
    %c0_0 = arith.constant 0 : index
    %1 = vector.load %arg6[%c0, %c0_0] : memref<20x160xf32, #tpu.memory_space<vmem>>, vector<20x160xf32>
    tpu.vector_store %arg6[%c0, %c0_0], %0 {strides = array<i32>} : memref<20x160xf32, #tpu.memory_space<vmem>>, vector<20x160xf32>,
    %c0_1 = arith.constant 0 : index
    %c0_2 = arith.constant 0 : index
    %c0_3 = arith.constant 0 : index
    %2 = vector.load %arg1[%c0_1, %c0_2, %c0_3] : memref<1x16x128xf32, #tpu.memory_space<vmem>>, vector<1x16x128xf32>
    %3 = vector.shape_cast %2 : vector<1x16x128xf32> to vector<16x128xf32>
    %c2 = arith.constant 2 : index
    %c16 = arith.constant 16 : index
    %4 = vector.load %arg6[%c2, %c16] : memref<20x160xf32, #tpu.memory_space<vmem>>, vector<16x128xf32>
    tpu.vector_store %arg6[%c2, %c16], %3 {strides = array<i32>} : memref<20x160xf32, #tpu.memory_space<vmem>>, vector<16x128xf32>,
    %cst_4 = arith.constant 0.000000e+00 : f32
    %5 = vector.broadcast %cst_4 : f32 to vector<16x128xf32>
    %c0_5 = arith.constant 0 : index
    %c0_6 = arith.constant 0 : index
    %6 = vector.load %arg6[%c0_5, %c0_6] : memref<20x160xf32, #tpu.memory_space<vmem>>, vector<16x160xf32>
    %7 = vector.extract_strided_slice %6 {offsets = [0, 0], sizes = [16, 128], strides = [1, 1]} : vector<16x160xf32> to vector<16x128xf32>
    %c0_7 = arith.constant 0 : index
    %c0_8 = arith.constant 0 : index
    %c0_9 = arith.constant 0 : index
    %8 = vector.load %arg2[%c0_7, %c0_8, %c0_9] : memref<1x25x128xf32, #tpu.memory_space<vmem>>, vector<1x1x128xf32>
    %9 = vector.shape_cast %8 : vector<1x1x128xf32> to vector<1x128xf32>
    %10 = vector.broadcast %9 : vector<1x128xf32> to vector<16x128xf32>
    %11 = arith.mulf %7, %10 : vector<16x128xf32>
    %12 = arith.addf %5, %11 : vector<16x128xf32>
    %13 = vector.extract_strided_slice %6 {offsets = [0, 8], sizes = [16, 128], strides = [1, 1]} : vector<16x160xf32> to vector<16x128xf32>
    %c0_10 = arith.constant 0 : index
    %c1 = arith.constant 1 : index
    %c0_11 = arith.constant 0 : index
    %14 = vector.load %arg2[%c0_10, %c1, %c0_11] : memref<1x25x128xf32, #tpu.memory_space<vmem>>, vector<1x1x128xf32>
    %15 = vector.shape_cast %14 : vector<1x1x128xf32> to vector<1x128xf32>
    %16 = vector.broadcast %15 : vector<1x128xf32> to vector<16x128xf32>
    %17 = arith.mulf %13, %16 : vector<16x128xf32>
    %18 = arith.addf %12, %17 : vector<16x128xf32>
    %19 = vector.extract_strided_slice %6 {offsets = [0, 16], sizes = [16, 128], strides = [1, 1]} : vector<16x160xf32> to vector<16x128xf32>
    %c0_12 = arith.constant 0 : index
    %c2_13 = arith.constant 2 : index
    %c0_14 = arith.constant 0 : index
    %20 = vector.load %arg2[%c0_12, %c2_13, %c0_14] : memref<1x25x128xf32, #tpu.memory_space<vmem>>, vector<1x1x128xf32>
    %21 = vector.shape_cast %20 : vector<1x1x128xf32> to vector<1x128xf32>
    %22 = vector.broadcast %21 : vector<1x128xf32> to vector<16x128xf32>
    %23 = arith.mulf %19, %22 : vector<16x128xf32>
    %24 = arith.addf %18, %23 : vector<16x128xf32>
    %25 = vector.extract_strided_slice %6 {offsets = [0, 24], sizes = [16, 128], strides = [1, 1]} : vector<16x160xf32> to vector<16x128xf32>
    %c0_15 = arith.constant 0 : index
    %c3 = arith.constant 3 : index
    %c0_16 = arith.constant 0 : index
    %26 = vector.load %arg2[%c0_15, %c3, %c0_16] : memref<1x25x128xf32, #tpu.memory_space<vmem>>, vector<1x1x128xf32>
    %27 = vector.shape_cast %26 : vector<1x1x128xf32> to vector<1x128xf32>
    %28 = vector.broadcast %27 : vector<1x128xf32> to vector<16x128xf32>
    %29 = arith.mulf %25, %28 : vector<16x128xf32>
    %30 = arith.addf %24, %29 : vector<16x128xf32>
    %31 = vector.extract_strided_slice %6 {offsets = [0, 32], sizes = [16, 128], strides = [1, 1]} : vector<16x160xf32> to vector<16x128xf32>
    %c0_17 = arith.constant 0 : index
    %c4 = arith.constant 4 : index
    %c0_18 = arith.constant 0 : index
    %32 = vector.load %arg2[%c0_17, %c4, %c0_18] : memref<1x25x128xf32, #tpu.memory_space<vmem>>, vector<1x1x128xf32>
    %33 = vector.shape_cast %32 : vector<1x1x128xf32> to vector<1x128xf32>
    %34 = vector.broadcast %33 : vector<1x128xf32> to vector<16x128xf32>
    %35 = arith.mulf %31, %34 : vector<16x128xf32>
    %36 = arith.addf %30, %35 : vector<16x128xf32>
    %c1_19 = arith.constant 1 : index
    %c0_20 = arith.constant 0 : index
    %37 = vector.load %arg6[%c1_19, %c0_20] : memref<20x160xf32, #tpu.memory_space<vmem>>, vector<16x160xf32>
    %38 = vector.extract_strided_slice %37 {offsets = [0, 0], sizes = [16, 128], strides = [1, 1]} : vector<16x160xf32> to vector<16x128xf32>
    %c0_21 = arith.constant 0 : index
    %c5 = arith.constant 5 : index
    %c0_22 = arith.constant 0 : index
    %39 = vector.load %arg2[%c0_21, %c5, %c0_22] : memref<1x25x128xf32, #tpu.memory_space<vmem>>, vector<1x1x128xf32>
    %40 = vector.shape_cast %39 : vector<1x1x128xf32> to vector<1x128xf32>
    %41 = vector.broadcast %40 : vector<1x128xf32> to vector<16x128xf32>
    %42 = arith.mulf %38, %41 : vector<16x128xf32>
    %43 = arith.addf %36, %42 : vector<16x128xf32>
    %44 = vector.extract_strided_slice %37 {offsets = [0, 8], sizes = [16, 128], strides = [1, 1]} : vector<16x160xf32> to vector<16x128xf32>
    %c0_23 = arith.constant 0 : index
    %c6 = arith.constant 6 : index
    %c0_24 = arith.constant 0 : index
    %45 = vector.load %arg2[%c0_23, %c6, %c0_24] : memref<1x25x128xf32, #tpu.memory_space<vmem>>, vector<1x1x128xf32>
    %46 = vector.shape_cast %45 : vector<1x1x128xf32> to vector<1x128xf32>
    %47 = vector.broadcast %46 : vector<1x128xf32> to vector<16x128xf32>
    %48 = arith.mulf %44, %47 : vector<16x128xf32>
    %49 = arith.addf %43, %48 : vector<16x128xf32>
    %50 = vector.extract_strided_slice %37 {offsets = [0, 16], sizes = [16, 128], strides = [1, 1]} : vector<16x160xf32> to vector<16x128xf32>
    %c0_25 = arith.constant 0 : index
    %c7 = arith.constant 7 : index
    %c0_26 = arith.constant 0 : index
    %51 = vector.load %arg2[%c0_25, %c7, %c0_26] : memref<1x25x128xf32, #tpu.memory_space<vmem>>, vector<1x1x128xf32>
    %52 = vector.shape_cast %51 : vector<1x1x128xf32> to vector<1x128xf32>
    %53 = vector.broadcast %52 : vector<1x128xf32> to vector<16x128xf32>
    %54 = arith.mulf %50, %53 : vector<16x128xf32>
    %55 = arith.addf %49, %54 : vector<16x128xf32>
    %56 = vector.extract_strided_slice %37 {offsets = [0, 24], sizes = [16, 128], strides = [1, 1]} : vector<16x160xf32> to vector<16x128xf32>
    %c0_27 = arith.constant 0 : index
    %c8 = arith.constant 8 : index
    %c0_28 = arith.constant 0 : index
    %57 = vector.load %arg2[%c0_27, %c8, %c0_28] : memref<1x25x128xf32, #tpu.memory_space<vmem>>, vector<1x1x128xf32>
    %58 = vector.shape_cast %57 : vector<1x1x128xf32> to vector<1x128xf32>
    %59 = vector.broadcast %58 : vector<1x128xf32> to vector<16x128xf32>
    %60 = arith.mulf %56, %59 : vector<16x128xf32>
    %61 = arith.addf %55, %60 : vector<16x128xf32>
    %62 = vector.extract_strided_slice %37 {offsets = [0, 32], sizes = [16, 128], strides = [1, 1]} : vector<16x160xf32> to vector<16x128xf32>
    %c0_29 = arith.constant 0 : index
    %c9 = arith.constant 9 : index
    %c0_30 = arith.constant 0 : index
    %63 = vector.load %arg2[%c0_29, %c9, %c0_30] : memref<1x25x128xf32, #tpu.memory_space<vmem>>, vector<1x1x128xf32>
    %64 = vector.shape_cast %63 : vector<1x1x128xf32> to vector<1x128xf32>
    %65 = vector.broadcast %64 : vector<1x128xf32> to vector<16x128xf32>
    %66 = arith.mulf %62, %65 : vector<16x128xf32>
    %67 = arith.addf %61, %66 : vector<16x128xf32>
    %c2_31 = arith.constant 2 : index
    %c0_32 = arith.constant 0 : index
    %68 = vector.load %arg6[%c2_31, %c0_32] : memref<20x160xf32, #tpu.memory_space<vmem>>, vector<16x160xf32>
    %69 = vector.extract_strided_slice %68 {offsets = [0, 0], sizes = [16, 128], strides = [1, 1]} : vector<16x160xf32> to vector<16x128xf32>
    %c0_33 = arith.constant 0 : index
    %c10 = arith.constant 10 : index
    %c0_34 = arith.constant 0 : index
    %70 = vector.load %arg2[%c0_33, %c10, %c0_34] : memref<1x25x128xf32, #tpu.memory_space<vmem>>, vector<1x1x128xf32>
    %71 = vector.shape_cast %70 : vector<1x1x128xf32> to vector<1x128xf32>
    %72 = vector.broadcast %71 : vector<1x128xf32> to vector<16x128xf32>
    %73 = arith.mulf %69, %72 : vector<16x128xf32>
    %74 = arith.addf %67, %73 : vector<16x128xf32>
    %75 = vector.extract_strided_slice %68 {offsets = [0, 8], sizes = [16, 128], strides = [1, 1]} : vector<16x160xf32> to vector<16x128xf32>
    %c0_35 = arith.constant 0 : index
    %c11 = arith.constant 11 : index
    %c0_36 = arith.constant 0 : index
    %76 = vector.load %arg2[%c0_35, %c11, %c0_36] : memref<1x25x128xf32, #tpu.memory_space<vmem>>, vector<1x1x128xf32>
    %77 = vector.shape_cast %76 : vector<1x1x128xf32> to vector<1x128xf32>
    %78 = vector.broadcast %77 : vector<1x128xf32> to vector<16x128xf32>
    %79 = arith.mulf %75, %78 : vector<16x128xf32>
    %80 = arith.addf %74, %79 : vector<16x128xf32>
    %81 = vector.extract_strided_slice %68 {offsets = [0, 16], sizes = [16, 128], strides = [1, 1]} : vector<16x160xf32> to vector<16x128xf32>
    %c0_37 = arith.constant 0 : index
    %c12 = arith.constant 12 : index
    %c0_38 = arith.constant 0 : index
    %82 = vector.load %arg2[%c0_37, %c12, %c0_38] : memref<1x25x128xf32, #tpu.memory_space<vmem>>, vector<1x1x128xf32>
    %83 = vector.shape_cast %82 : vector<1x1x128xf32> to vector<1x128xf32>
    %84 = vector.broadcast %83 : vector<1x128xf32> to vector<16x128xf32>
    %85 = arith.mulf %81, %84 : vector<16x128xf32>
    %86 = arith.addf %80, %85 : vector<16x128xf32>
    %87 = vector.extract_strided_slice %68 {offsets = [0, 24], sizes = [16, 128], strides = [1, 1]} : vector<16x160xf32> to vector<16x128xf32>
    %c0_39 = arith.constant 0 : index
    %c13 = arith.constant 13 : index
    %c0_40 = arith.constant 0 : index
    %88 = vector.load %arg2[%c0_39, %c13, %c0_40] : memref<1x25x128xf32, #tpu.memory_space<vmem>>, vector<1x1x128xf32>
    %89 = vector.shape_cast %88 : vector<1x1x128xf32> to vector<1x128xf32>
    %90 = vector.broadcast %89 : vector<1x128xf32> to vector<16x128xf32>
    %91 = arith.mulf %87, %90 : vector<16x128xf32>
    %92 = arith.addf %86, %91 : vector<16x128xf32>
    %93 = vector.extract_strided_slice %68 {offsets = [0, 32], sizes = [16, 128], strides = [1, 1]} : vector<16x160xf32> to vector<16x128xf32>
    %c0_41 = arith.constant 0 : index
    %c14 = arith.constant 14 : index
    %c0_42 = arith.constant 0 : index
    %94 = vector.load %arg2[%c0_41, %c14, %c0_42] : memref<1x25x128xf32, #tpu.memory_space<vmem>>, vector<1x1x128xf32>
    %95 = vector.shape_cast %94 : vector<1x1x128xf32> to vector<1x128xf32>
    %96 = vector.broadcast %95 : vector<1x128xf32> to vector<16x128xf32>
    %97 = arith.mulf %93, %96 : vector<16x128xf32>
    %98 = arith.addf %92, %97 : vector<16x128xf32>
    %c3_43 = arith.constant 3 : index
    %c0_44 = arith.constant 0 : index
    %99 = vector.load %arg6[%c3_43, %c0_44] : memref<20x160xf32, #tpu.memory_space<vmem>>, vector<16x160xf32>
    %100 = vector.extract_strided_slice %99 {offsets = [0, 0], sizes = [16, 128], strides = [1, 1]} : vector<16x160xf32> to vector<16x128xf32>
    %c0_45 = arith.constant 0 : index
    %c15 = arith.constant 15 : index
    %c0_46 = arith.constant 0 : index
    %101 = vector.load %arg2[%c0_45, %c15, %c0_46] : memref<1x25x128xf32, #tpu.memory_space<vmem>>, vector<1x1x128xf32>
    %102 = vector.shape_cast %101 : vector<1x1x128xf32> to vector<1x128xf32>
    %103 = vector.broadcast %102 : vector<1x128xf32> to vector<16x128xf32>
    %104 = arith.mulf %100, %103 : vector<16x128xf32>
    %105 = arith.addf %98, %104 : vector<16x128xf32>
    %106 = vector.extract_strided_slice %99 {offsets = [0, 8], sizes = [16, 128], strides = [1, 1]} : vector<16x160xf32> to vector<16x128xf32>
    %c0_47 = arith.constant 0 : index
    %c16_48 = arith.constant 16 : index
    %c0_49 = arith.constant 0 : index
    %107 = vector.load %arg2[%c0_47, %c16_48, %c0_49] : memref<1x25x128xf32, #tpu.memory_space<vmem>>, vector<1x1x128xf32>
    %108 = vector.shape_cast %107 : vector<1x1x128xf32> to vector<1x128xf32>
    %109 = vector.broadcast %108 : vector<1x128xf32> to vector<16x128xf32>
    %110 = arith.mulf %106, %109 : vector<16x128xf32>
    %111 = arith.addf %105, %110 : vector<16x128xf32>
    %112 = vector.extract_strided_slice %99 {offsets = [0, 16], sizes = [16, 128], strides = [1, 1]} : vector<16x160xf32> to vector<16x128xf32>
    %c0_50 = arith.constant 0 : index
    %c17 = arith.constant 17 : index
    %c0_51 = arith.constant 0 : index
    %113 = vector.load %arg2[%c0_50, %c17, %c0_51] : memref<1x25x128xf32, #tpu.memory_space<vmem>>, vector<1x1x128xf32>
    %114 = vector.shape_cast %113 : vector<1x1x128xf32> to vector<1x128xf32>
    %115 = vector.broadcast %114 : vector<1x128xf32> to vector<16x128xf32>
    %116 = arith.mulf %112, %115 : vector<16x128xf32>
    %117 = arith.addf %111, %116 : vector<16x128xf32>
    %118 = vector.extract_strided_slice %99 {offsets = [0, 24], sizes = [16, 128], strides = [1, 1]} : vector<16x160xf32> to vector<16x128xf32>
    %c0_52 = arith.constant 0 : index
    %c18 = arith.constant 18 : index
    %c0_53 = arith.constant 0 : index
    %119 = vector.load %arg2[%c0_52, %c18, %c0_53] : memref<1x25x128xf32, #tpu.memory_space<vmem>>, vector<1x1x128xf32>
    %120 = vector.shape_cast %119 : vector<1x1x128xf32> to vector<1x128xf32>
    %121 = vector.broadcast %120 : vector<1x128xf32> to vector<16x128xf32>
    %122 = arith.mulf %118, %121 : vector<16x128xf32>
    %123 = arith.addf %117, %122 : vector<16x128xf32>
    %124 = vector.extract_strided_slice %99 {offsets = [0, 32], sizes = [16, 128], strides = [1, 1]} : vector<16x160xf32> to vector<16x128xf32>
    %c0_54 = arith.constant 0 : index
    %c19 = arith.constant 19 : index
    %c0_55 = arith.constant 0 : index
    %125 = vector.load %arg2[%c0_54, %c19, %c0_55] : memref<1x25x128xf32, #tpu.memory_space<vmem>>, vector<1x1x128xf32>
    %126 = vector.shape_cast %125 : vector<1x1x128xf32> to vector<1x128xf32>
    %127 = vector.broadcast %126 : vector<1x128xf32> to vector<16x128xf32>
    %128 = arith.mulf %124, %127 : vector<16x128xf32>
    %129 = arith.addf %123, %128 : vector<16x128xf32>
    %c4_56 = arith.constant 4 : index
    %c0_57 = arith.constant 0 : index
    %130 = vector.load %arg6[%c4_56, %c0_57] : memref<20x160xf32, #tpu.memory_space<vmem>>, vector<16x160xf32>
    %131 = vector.extract_strided_slice %130 {offsets = [0, 0], sizes = [16, 128], strides = [1, 1]} : vector<16x160xf32> to vector<16x128xf32>
    %c0_58 = arith.constant 0 : index
    %c20 = arith.constant 20 : index
    %c0_59 = arith.constant 0 : index
    %132 = vector.load %arg2[%c0_58, %c20, %c0_59] : memref<1x25x128xf32, #tpu.memory_space<vmem>>, vector<1x1x128xf32>
    %133 = vector.shape_cast %132 : vector<1x1x128xf32> to vector<1x128xf32>
    %134 = vector.broadcast %133 : vector<1x128xf32> to vector<16x128xf32>
    %135 = arith.mulf %131, %134 : vector<16x128xf32>
    %136 = arith.addf %129, %135 : vector<16x128xf32>
    %137 = vector.extract_strided_slice %130 {offsets = [0, 8], sizes = [16, 128], strides = [1, 1]} : vector<16x160xf32> to vector<16x128xf32>
    %c0_60 = arith.constant 0 : index
    %c21 = arith.constant 21 : index
    %c0_61 = arith.constant 0 : index
    %138 = vector.load %arg2[%c0_60, %c21, %c0_61] : memref<1x25x128xf32, #tpu.memory_space<vmem>>, vector<1x1x128xf32>
    %139 = vector.shape_cast %138 : vector<1x1x128xf32> to vector<1x128xf32>
    %140 = vector.broadcast %139 : vector<1x128xf32> to vector<16x128xf32>
    %141 = arith.mulf %137, %140 : vector<16x128xf32>
    %142 = arith.addf %136, %141 : vector<16x128xf32>
    %143 = vector.extract_strided_slice %130 {offsets = [0, 16], sizes = [16, 128], strides = [1, 1]} : vector<16x160xf32> to vector<16x128xf32>
    %c0_62 = arith.constant 0 : index
    %c22 = arith.constant 22 : index
    %c0_63 = arith.constant 0 : index
    %144 = vector.load %arg2[%c0_62, %c22, %c0_63] : memref<1x25x128xf32, #tpu.memory_space<vmem>>, vector<1x1x128xf32>
    %145 = vector.shape_cast %144 : vector<1x1x128xf32> to vector<1x128xf32>
    %146 = vector.broadcast %145 : vector<1x128xf32> to vector<16x128xf32>
    %147 = arith.mulf %143, %146 : vector<16x128xf32>
    %148 = arith.addf %142, %147 : vector<16x128xf32>
    %149 = vector.extract_strided_slice %130 {offsets = [0, 24], sizes = [16, 128], strides = [1, 1]} : vector<16x160xf32> to vector<16x128xf32>
    %c0_64 = arith.constant 0 : index
    %c23 = arith.constant 23 : index
    %c0_65 = arith.constant 0 : index
    %150 = vector.load %arg2[%c0_64, %c23, %c0_65] : memref<1x25x128xf32, #tpu.memory_space<vmem>>, vector<1x1x128xf32>
    %151 = vector.shape_cast %150 : vector<1x1x128xf32> to vector<1x128xf32>
    %152 = vector.broadcast %151 : vector<1x128xf32> to vector<16x128xf32>
    %153 = arith.mulf %149, %152 : vector<16x128xf32>
    %154 = arith.addf %148, %153 : vector<16x128xf32>
    %155 = vector.extract_strided_slice %130 {offsets = [0, 32], sizes = [16, 128], strides = [1, 1]} : vector<16x160xf32> to vector<16x128xf32>
    %c0_66 = arith.constant 0 : index
    %c24 = arith.constant 24 : index
    %c0_67 = arith.constant 0 : index
    %156 = vector.load %arg2[%c0_66, %c24, %c0_67] : memref<1x25x128xf32, #tpu.memory_space<vmem>>, vector<1x1x128xf32>
    %157 = vector.shape_cast %156 : vector<1x1x128xf32> to vector<1x128xf32>
    %158 = vector.broadcast %157 : vector<1x128xf32> to vector<16x128xf32>
    %159 = arith.mulf %155, %158 : vector<16x128xf32>
    %160 = arith.addf %154, %159 : vector<16x128xf32>
    %c0_68 = arith.constant 0 : index
    %c0_69 = arith.constant 0 : index
    %161 = vector.load %arg3[%c0_68, %c0_69] : memref<128x128xf32, #tpu.memory_space<vmem>>, vector<128x128xf32>
    %cst_70 = arith.constant dense<0.000000e+00> : vector<16x128xf32>
    %162 = tpu.matmul %160, %161, %cst_70 {dimension_numbers = #tpu.dot_dimension_numbers<[1], [0], [0], [1], [0, 0, 1, 1], [], []>} : vector<16x128xf32>, vector<128x128xf32>, vector<16x128xf32> -> vector<16x128xf32>
    %c0_71 = arith.constant 0 : index
    %c0_72 = arith.constant 0 : index
    %163 = vector.load %arg4[%c0_71, %c0_72] : memref<1x128xf32, #tpu.memory_space<vmem>>, vector<1x128xf32>
    %164 = vector.shape_cast %163 : vector<1x128xf32> to vector<128xf32>
    %165 = vector.shape_cast %164 : vector<128xf32> to vector<1x128xf32>
    %166 = vector.broadcast %165 : vector<1x128xf32> to vector<16x128xf32>
    %167 = arith.addf %162, %166 : vector<16x128xf32>
    %c0_73 = arith.constant 0 : index
    %c0_74 = arith.constant 0 : index
    %c0_75 = arith.constant 0 : index
    %168 = vector.load %arg5[%c0_73, %c0_74, %c0_75] : memref<1x16x128xf32, #tpu.memory_space<vmem>>, vector<1x16x128xf32>
    %169 = vector.shape_cast %168 : vector<1x16x128xf32> to vector<16x128xf32>
    %170 = vector.shape_cast %167 : vector<16x128xf32> to vector<1x16x128xf32>
    tpu.vector_store %arg5[%c0_73, %c0_74, %c0_75], %170 {strides = array<i32>} : memref<1x16x128xf32, #tpu.memory_space<vmem>>, vector<1x16x128xf32>,
    return
  }
  func.func @transform_0(%arg0: i32) -> (i32, i32, i32) {
    %c0_i32 = arith.constant 0 : i32
    %c0_i32_0 = arith.constant 0 : i32
    %c0_i32_1 = arith.constant 0 : i32
    return %arg0, %c0_i32, %c0_i32_0 : i32, i32, i32
  }
  func.func @transform_1(%arg0: i32) -> (i32, i32, i32) {
    %c0_i32 = arith.constant 0 : i32
    %c0_i32_0 = arith.constant 0 : i32
    %c0_i32_1 = arith.constant 0 : i32
    return %arg0, %c0_i32, %c0_i32_0 : i32, i32, i32
  }
  func.func @transform_2(%arg0: i32) -> (i32, i32) {
    %c0_i32 = arith.constant 0 : i32
    %c0_i32_0 = arith.constant 0 : i32
    %c0_i32_1 = arith.constant 0 : i32
    return %c0_i32, %c0_i32_0 : i32, i32
  }
  func.func @transform_3(%arg0: i32) -> (i32, i32) {
    %c0_i32 = arith.constant 0 : i32
    %c0_i32_0 = arith.constant 0 : i32
    %c0_i32_1 = arith.constant 0 : i32
    return %c0_i32, %c0_i32_0 : i32, i32
  }
  func.func @transform_4(%arg0: i32) -> (i32, i32, i32) {
    %c0_i32 = arith.constant 0 : i32
    %c0_i32_0 = arith.constant 0 : i32
    %c0_i32_1 = arith.constant 0 : i32
    return %arg0, %c0_i32, %c0_i32_0 : i32, i32, i32
  }
}

</mosaic_0001>

<bundles_post_ra>
// kernel: siamfc_head_depwise.1
= control target key start
LH: loop header
LB: loop body
LE: loop exit
PB: predicated region body
PF: predicated region fallthrough
CT: control target
= control target key end

     0   :  { %s1370_s15 = smov 0   ;;  %s2049_s0 = inlined_call_operand.vmem [shape: f32[2,16,128], index: 0, kind: input, shape index: {}]   ;;  %s2050_s1 = inlined_call_operand.vmem [shape: f32[2,25,128], index: 1, kind: input, shape index: {}]   ;;  %s2051_s2 = inlined_call_operand.vmem [shape: f32[128,128], index: 2, kind: input, shape index: {}]   ;;  %s2052_s3 = inlined_call_operand.vmem [shape: f32[1,128], index: 3, kind: input, shape index: {}]   ;;  %s2053_s4 = inlined_call_operand.vmem [shape: f32[2,16,128], index: 4, kind: output, shape index: {}]  }
   0x1 LB: > { %s1253_s16 = sadd.s32 4294967295, %s1334_s15   ;;  %p1257_p0 = scmp.ge.s32.totalorder %s1334_s15, 1  ;;  %s1334_s15 = sphi %s1370_s15, %s14_s15  }
   0x2   : > { %p172_p1 = scmp.lt.s32.totalorder %s1334_s15, 3 }
   0x4   : > { %p173_p2 = pnand %p1257_p0, %p172_p1 }
   0x5   : > { %p203_p3 = scmp.lt.s32.totalorder (!%p173_p2), %s1253_s16, 1  ;;  %s1336_s25 = smov (!%p173_p2), 16  }
   0x6   : > { %176 = sbr.rel (%p173_p2) target bundleno = 599 (0x257), region = 36  ;;  %s1337_s26 = smov (!%p173_p2), 8  }
   0x7   : > { %s1338_s27 = smov (!%p173_p2), 32   ;;  %s1339_s28 = smov (!%p173_p2), 24  }
   0x8   : > { %s1341_s29 = smov (!%p173_p2), 120   ;;  %s1342_s30 = smov (!%p173_p2), 112  }
   0x9   : > { %s1343_s5 = smov (!%p173_p2), 104   ;;  %s1344_s6 = smov (!%p173_p2), 96  }
   0xb   : > { %s2055_s16 = smov (!%p203_p3, %s1253_s16), 1  ;;  %vm230_vm0 = vcmask 1041408   ;;  %vm224_vm1 = vcmask 257024   ;;  %v1340_v25 = vmov 0.0   ;;  %vm219_vm2 = vcmask 261120  }
   0xc   : > { %s1267_s17 = sshll.u32 %s2055_s16, 5  ;;  %s1266_s18 = sshll.u32 %s2055_s16, 4  ;;  %223 = vst [vmem:[#allocation2 + $0x20] sm:$0xf] %v1340_v25  ;;  %vm251_vm3 = vcmask 1041536   ;;  %vm253_vm4 = vcmask 123904  }
   0xd   : > { %s1385_s21 = scalar_lea.vmem %s2050_s1, %s1267_s17  ;;  %s207_s24 = scalar_lea.vmem %s2049_s0, %s1266_s18  ;;  %225 = vst.msk [vmem:[#allocation2 + $0x28] sm:$0xf] %vm224_vm1, %v1340_v25  ;;  %vm243_vm5 = vcmask 1047682   ;;  %vm245_vm6 = vcmask 130050   ;;  %vm247_vm7 = vcmask 1047680   ;;  %vm249_vm8 = vcmask 130048  }
   0xe   : > { %v1302_v0 = vld [vmem:[%s1385_s21 + $0x2] ss:$0 sm:$0xff]  ;;  %v227_v1 = vld [vmem:[%s207_s24 + $0x8] sm:$0xff]  ;;  %v1303_v5 = vld [vmem:[%s1385_s21 + $0x6] ss:$0 sm:$0xff]  ;;  %218 = vst [vmem:[#allocation2] sm:$0xff] %v1340_v25  ;;  %s217_s23 = scalar_lea.vmem %s2053_s4, %s1266_s18 }
   0xf   : > { %v232_v2 = vrot.slane %v227_v1, 6  ;;  %v226_v3 = vld [vmem:[%s207_s24] sm:$0xff]  ;;  %297 = vrot.lane.b32.xlu2 %v1302_v0, %s1336_s25  ;;  %v1305_v8 = vld [vmem:[%s1385_s21 + $0x9] ss:$0 sm:$0xff]  ;;  %v1308_v11 = vld [vmem:[%s1385_s21 + $0xd] ss:$0 sm:$0xff] }
  0x10   : > { %v231_v4 = vrot.slane %v226_v3, 6  ;;  %v1304_v6 = vld [vmem:[%s1385_s21 + $0x1] ss:$0 sm:$0xff]  ;;  %v1306_v9 = vld [vmem:[%s1385_s21 + $0x3] ss:$0 sm:$0xff]  ;;  %221 = vst [vmem:[#allocation2 + $0x10] sm:$0xff] %v1340_v25 }
  0x11   : > { %238 = vrot.lane.b32.xlu1 %v232_v2, %s1336_s25  ;;  %v1307_v10 = vld [vmem:[%s1385_s21 + $0x4] ss:$0 sm:$0xff]  ;;  %v1309_v12 = vld [vmem:[%s1385_s21 + $0x8] ss:$0 sm:$0xff]  ;;  %v1310_v13 = vld [vmem:[%s1385_s21 + $0x7] ss:$0 sm:$0xff] }
  0x12   : > { %234 = vrot.lane.b32.xlu0 %v231_v4, %s1336_s25  ;;  %v233_v7 = vsel %vm230_vm0, %v231_v4, %v232_v2  ;;  %v1311_v14 = vld [vmem:[%s1385_s21 + $0x11] ss:$0 sm:$0xff]  ;;  %v1312_v15 = vld [vmem:[%s1385_s21 + $0xc] ss:$0 sm:$0xff]  ;;  %v1313_v16 = vld [vmem:[%s1385_s21 + $0xb] ss:$0 sm:$0xff] }
  0x13   : > { %v1314_v17 = vld [vmem:[%s1385_s21 + $0x15] ss:$0 sm:$0xff]  ;;  %v1315_v18 = vld [vmem:[%s1385_s21 + $0x10] ss:$0 sm:$0xff]  ;;  %v1316_v19 = vld [vmem:[%s1385_s21 + $0xe] ss:$0 sm:$0xff] }
  0x14   : > { %v1317_v20 = vld [vmem:[%s1385_s21 + $0x18] ss:$0 sm:$0xff]  ;;  %v1318_v21 = vld [vmem:[%s1385_s21 + $0x13] ss:$0 sm:$0xff]  ;;  %v1319_v22 = vld [vmem:[%s1385_s21 + $0x12] ss:$0 sm:$0xff] }
  0x15   : > { %v1320_v23 = vld [vmem:[%s1385_s21 + $0x17] ss:$0 sm:$0xff]  ;;  %v1321_v24 = vld [vmem:[%s1385_s21 + $0x16] ss:$0 sm:$0xff]  ;;  %220 = vst.msk [vmem:[#allocation2 + $0x8] sm:$0xff] %vm219_vm2, %v1340_v25  ;;  %vm393_vm9 = vcmask 1046528  }
  0x16   : > { %222 = vst.msk [vmem:[#allocation2 + $0x18] sm:$0xff] %vm219_vm2, %v1340_v25  ;;  %vm963_vm10 = vcmask 1043456   ;;  %vm583_vm11 = vcmask 1045504   ;;  %vm773_vm12 = vcmask 1044480   ;;  %vm287_vm13 = vcmask 982016  }
  0x17   : > { %406 = vrot.lane.b32.xlu2 %v1303_v5, %s1337_s26  ;;  %v1323_v5 = vld [vmem:[%s1385_s21 + $0x5] ss:$0 sm:$0xff]  ;;  %vm316_vm14 = vcmask 916480   ;;  %vm345_vm15 = vcmask 850944   ;;  %vm374_vm0 = vcmask 785408  }
  0x19   : > { %268 = vrot.lane.b32.xlu1 %v1304_v6, %s1337_s26 }
  0x1a   : > { %236 = vrot.lane.b32.xlu0 %v233_v7, %s1336_s25 }
  0x1f   : > { %532 = vrot.lane.b32.xlu2 %v1305_v8, %s1338_s27 }
  0x21   : > { %326 = vrot.lane.b32.xlu1 %v1306_v9, %s1339_s28 }
  0x22   : > { %355 = vrot.lane.b32.xlu0 %v1307_v10, %s1338_s27 }
  0x27   : > { %680 = vrot.lane.b32.xlu2 %v1308_v11, %s1339_s28 }
  0x29   : > { %490 = vrot.lane.b32.xlu1 %v1309_v12, %s1339_s28 }
  0x2a   : > { %448 = vrot.lane.b32.xlu0 %v1310_v13, %s1336_s25 }
  0x2f   : > { %828 = vrot.lane.b32.xlu2 %v1311_v14, %s1336_s25 }
  0x31   : > { %638 = vrot.lane.b32.xlu1 %v1312_v15, %s1336_s25 }
  0x32   : > { %596 = vrot.lane.b32.xlu0 %v1313_v16, %s1337_s26 }
  0x37   : > { %976 = vrot.lane.b32.xlu2 %v1314_v17, %s1337_s26 }
  0x39   : > { %786 = vrot.lane.b32.xlu1 %v1315_v18, %s1337_s26 }
  0x3a   : > { %722 = vrot.lane.b32.xlu0 %v1316_v19, %s1338_s27 }
  0x3f   : > { %1102 = vrot.lane.b32.xlu2 %v1317_v20, %s1338_s27 }
  0x41   : > { %912 = vrot.lane.b32.xlu1 %v1318_v21, %s1338_s27 }
  0x42   : > { %870 = vrot.lane.b32.xlu0 %v1319_v22, %s1339_s28 }
  0x49   : > { %1060 = vrot.lane.b32.xlu1 %v1320_v23, %s1339_s28 }
  0x4a   : > { %1018 = vrot.lane.b32.xlu0 %v1321_v24, %s1336_s25 }
  0x69   : > { %v298_v28 = vpop.permute.xlu2 %297 }
  0x71   : > { %v1424_v36 = vpop.permute.xlu2 %406 }
  0x79   : > { %v1433_v42 = vpop.permute.xlu2 %532 }
  0x81   : > { %v1448_v50 = vpop.permute.xlu2 %680 }
  0x83   : > { %v239_v26 = vpop.permute.xlu1 %238 }
  0x84   : > { %252 = vst.msk [vmem:[#allocation2 + $0x20] sm:$0x3] %vm251_vm3, %v239_v26  ;;  %v235_v27 = vpop.permute.xlu0 %234 }
  0x85   : > { %254 = vst.msk [vmem:[#allocation2 + $0x28] sm:$0x3] %vm253_vm4, %v239_v26 }
  0x86   : > { %244 = vst.msk [vmem:[#allocation2] sm:$0xfc] %vm243_vm5, %v235_v27 }
  0x87   : > { %246 = vst.msk [vmem:[#allocation2 + $0x8] sm:$0xfc] %vm245_vm6, %v235_v27 }
  0x89   : > { %v1460_v56 = vpop.permute.xlu2 %828 }
  0x8b   : > { %v269_v29 = vpop.permute.xlu1 %268  ;;  %v1486_v10 = vld [vmem:[#allocation2 + $0x20] sm:$0x1] }
  0x8c   : > { %v237_v30 = vpop.permute.xlu0 %236  ;;  %v1488_v11 = vld [vmem:[#allocation2 + $0x28] sm:$0x1]  ;;  %v413_v19 = vmul.f32 %v1424_v36, %v1486_v10  ;;  %v389_v21 = vmul.f32 %v1323_v5, %v1486_v10 }
  0x8d   : > { %248 = vst.msk [vmem:[#allocation2 + $0x10] sm:$0xff] %vm247_vm7, %v237_v30  ;;  %v1420_v31 = vld [vmem:[#allocation2] sm:$0xff]  ;;  %v414_v20 = vmul.f32 %v1424_v36, %v1488_v11 }
  0x8e   : > { %250 = vst.msk [vmem:[#allocation2 + $0x18] sm:$0xff] %vm249_vm8, %v237_v30  ;;  %v256_v32 = vld [vmem:[#allocation2 + $0x8] sm:$0xff]  ;;  %v271_v33 = vmul.f32 %v269_v29, %v1420_v31  ;;  %v300_v34 = vmul.f32 %v298_v28, %v1420_v31  ;;  %v1464_v59 = vld [vmem:[#allocation2] sm:$0xfe]  ;;  %v397_v24 = vrot.slane %v389_v21, 1 }
  0x8f   : > { %v301_v35 = vmul.f32 %v298_v28, %v256_v32  ;;  %v272_v41 = vmul.f32 %v269_v29, %v256_v32  ;;  %v1466_v60 = vld [vmem:[#allocation2 + $0x8] sm:$0xfe]  ;;  %v409_v0 = vmul.f32 %v1424_v36, %v1464_v59  ;;  %v387_v14 = vmul.f32 %v1323_v5, %v1464_v59 }
  0x90   : > { %279 = vrot.lane.b32.xlu2 %v271_v33, %s1341_s29  ;;  %308 = vrot.lane.b32.xlu0 %v300_v34, %s1342_s30  ;;  %v410_v1 = vmul.f32 %v1424_v36, %v1466_v60  ;;  %v429_v33 = vrot.slane %v414_v20, 1 }
  0x91   : > { %310 = vrot.lane.b32.xlu1 %v301_v35, %s1342_s30  ;;  %v421_v7 = vrot.slane %v409_v0, 1  ;;  %v1493_v15 = vpop.permute.xlu2 %976  ;;  %v394_v22 = vrot.slane %v387_v14, 1 }
  0x92   : > { %v424_v8 = vrot.slane %v410_v1, 1 }
  0x93   : > { %v327_v37 = vpop.permute.xlu1 %326 }
  0x94   : > { %v356_v38 = vpop.permute.xlu0 %355  ;;  %v330_v39 = vmul.f32 %v327_v37, %v256_v32  ;;  %v329_v44 = vmul.f32 %v327_v37, %v1420_v31  ;;  %v1446_v49 = vld [vmem:[#allocation2 + $0x10] sm:$0xff] }
  0x95   : > { %v358_v40 = vmul.f32 %v356_v38, %v1420_v31  ;;  %v1435_v43 = vld [vmem:[#allocation2 + $0x18] sm:$0xff]  ;;  %v359_v45 = vmul.f32 %v356_v38, %v256_v32  ;;  %v302_v51 = vmul.f32 %v298_v28, %v1446_v49  ;;  %v273_v52 = vmul.f32 %v269_v29, %v1446_v49 }
  0x96   : > { %v274_v47 = vmul.f32 %v269_v29, %v1435_v43  ;;  %v331_v53 = vmul.f32 %v327_v37, %v1446_v49  ;;  %v332_v57 = vmul.f32 %v327_v37, %v1435_v43  ;;  %v303_v58 = vmul.f32 %v298_v28, %v1435_v43  ;;  %v1513_v29 = vld [vmem:[#allocation2 + $0x8] sm:$0xf0] }
  0x97   : > { %v360_v61 = vmul.f32 %v356_v38, %v1446_v49  ;;  %v411_v62 = vmul.f32 %v1424_v36, %v1446_v49  ;;  %v412_v63 = vmul.f32 %v1424_v36, %v1435_v43  ;;  %v361_v9 = vmul.f32 %v356_v38, %v1435_v43  ;;  %v1522_v36 = vld [vmem:[#allocation2 + $0x28] sm:$0xf] }
  0x98   : > { %281 = vrot.lane.b32.xlu2 %v272_v41, %s1341_s29  ;;  %339 = vrot.lane.b32.xlu0 %v330_v39, %s1343_s5  ;;  %v388_v18 = vmul.f32 %v1323_v5, %v1446_v49  ;;  %v982_v25 = vmul.f32 %v1493_v15, %v1435_v43  ;;  %v427_v32 = vrot.slane %v413_v19, 1  ;;  %v980_v35 = vmul.f32 %v1493_v15, %v1513_v29 }
  0x99   : > { %366 = vrot.lane.b32.xlu1 %v358_v40, %s1344_s6  ;;  %v422_v3 = vrot.slane %v411_v62, 1  ;;  %v425_v4 = vrot.slane %v412_v63, 1  ;;  %v984_v39 = vmul.f32 %v1493_v15, %v1522_v36 }
  0x9a   : > { %v395_v23 = vrot.slane %v388_v18, 1 }
  0x9b   : > { %v1441_v48 = vpop.permute.xlu1 %490  ;;  %v423_v12 = vsel %vm393_vm9, %v421_v7, %v422_v3  ;;  %v426_v13 = vsel %vm393_vm9, %v424_v8, %v425_v4  ;;  %v428_v40 = vsel %vm393_vm9, %v422_v3, %v427_v32  ;;  %v430_v41 = vsel %vm393_vm9, %v425_v4, %v429_v33  ;;  %v1558_v7 = vpop.permute.xlu2 %1102 }
  0x9c   : > { %v1438_v46 = vpop.permute.xlu0 %448  ;;  %v1511_v28 = vsel %vm393_vm9, %v394_v22, %v395_v23  ;;  %v1518_v34 = vsel %vm393_vm9, %v395_v23, %v397_v24  ;;  %v999_v62 = vrot.slane %v984_v39, 4  ;;  %v1562_v8 = vmul.f32 %v1441_v48, %v1435_v43 }
  0x9d   : > { %v451_v16 = vmul.f32 %v1438_v46, %v1464_v59  ;;  %v453_v17 = vmul.f32 %v1438_v46, %v1446_v49  ;;  %v455_v38 = vmul.f32 %v1438_v46, %v1486_v10  ;;  %v497_v22 = vmul.f32 %v1441_v48, %v1486_v10 }
  0x9f   : > { %v463_v26 = vrot.slane %v451_v16, 1  ;;  %v464_v27 = vrot.slane %v453_v17, 1 }
  0xa0   : > { %337 = vrot.lane.b32.xlu2 %v329_v44, %s1343_s5  ;;  %368 = vrot.lane.b32.xlu0 %v359_v45, %s1344_s6  ;;  %v452_v44 = vmul.f32 %v1438_v46, %v1466_v60  ;;  %v454_v45 = vmul.f32 %v1438_v46, %v1435_v43 }
  0xa1   : > { %285 = vrot.lane.b32.xlu1 %v274_v47, %s1341_s29  ;;  %v1537_v47 = vld [vmem:[%s1385_s21 + $0xa] ss:$0 sm:$0xff] }
  0xa2   : > { %v466_v63 = vrot.slane %v452_v44, 1  ;;  %v467_v0 = vrot.slane %v454_v45, 1  ;;  %v1551_v3 = vmul.f32 %v1537_v47, %v1446_v49  ;;  %v1106_v45 = vmul.f32 %v1558_v7, %v1513_v29 }
  0xa3   : > { %v1458_v55 = vpop.permute.xlu1 %638 }
  0xa4   : > { %v1455_v54 = vpop.permute.xlu0 %596  ;;  %v468_v17 = vsel %vm393_vm9, %v466_v63, %v467_v0  ;;  %v585_v19 = vrot.slane %v1551_v3, 2  ;;  %v498_v63 = vmul.f32 %v1441_v48, %v1488_v11 }
  0xa8   : > { %312 = vrot.lane.b32.xlu2 %v302_v51, %s1342_s30  ;;  %283 = vrot.lane.b32.xlu0 %v273_v52, %s1341_s29  ;;  %v465_v51 = vsel %vm393_vm9, %v463_v26, %v464_v27  ;;  %v456_v52 = vmul.f32 %v1438_v46, %v1488_v11  ;;  %v494_v46 = vmul.f32 %v1441_v48, %v1466_v60  ;;  %v509_v26 = vrot.slane %v1562_v8, 1 }
  0xa9   : > { %341 = vrot.lane.b32.xlu1 %v331_v53, %s1343_s5  ;;  %v1544_v53 = vld [vmem:[#allocation2] sm:$0xfc]  ;;  %v535_v8 = vmul.f32 %v1433_v42, %v1464_v59 }
  0xaa   : > { %v577_v1 = vmul.f32 %v1537_v47, %v1544_v53  ;;  %v471_v4 = vrot.slane %v456_v52, 1  ;;  %v508_v23 = vrot.slane %v494_v46, 1 }
  0xab   : > { %v1483_v6 = vpop.permute.xlu1 %786 }
  0xac   : > { %v1480_v2 = vpop.permute.xlu0 %722  ;;  %v584_v18 = vrot.slane %v577_v1, 2  ;;  %v472_v21 = vsel %vm393_vm9, %v467_v0, %v471_v4  ;;  %v538_v0 = vmul.f32 %v1433_v42, %v1435_v43 }
  0xae   : > { %v1587_v24 = vsel %vm583_vm11, %v584_v18, %v585_v19 }
  0xb0   : > { %343 = vrot.lane.b32.xlu2 %v332_v57, %s1343_s5  ;;  %314 = vrot.lane.b32.xlu0 %v303_v58, %s1342_s30  ;;  %v994_v57 = vrot.slane %v980_v35, 4  ;;  %v995_v58 = vrot.slane %v982_v25, 4  ;;  %v1108_v25 = vmul.f32 %v1558_v7, %v1435_v43 }
  0xb1   : > { %370 = vrot.lane.b32.xlu1 %v360_v61, %s1344_s6  ;;  %v469_v61 = vrot.slane %v455_v38, 1 }
  0xb2   : > { %v1556_v5 = vsel %vm963_vm10, %v994_v57, %v995_v58  ;;  %v1121_v18 = vrot.slane %v1108_v25, 4  ;;  %v547_v25 = vrot.slane %v535_v8, 1  ;;  %v539_v8 = vmul.f32 %v1433_v42, %v1486_v10 }
  0xb3   : > { %v1524_v37 = vpop.permute.xlu1 %912  ;;  %v470_v16 = vsel %vm393_vm9, %v464_v27, %v469_v61  ;;  %v510_v61 = vsel %vm393_vm9, %v508_v23, %v509_v26  ;;  %v551_v23 = vrot.slane %v538_v0, 1 }
  0xb4   : > { %v1515_v30 = vpop.permute.xlu0 %870 }
  0xb8   : > { %372 = vrot.lane.b32.xlu2 %v361_v9, %s1344_s6  ;;  %431 = vrot.lane.b32.xlu0 %v423_v12, %s1341_s29  ;;  %v493_v9 = vmul.f32 %v1441_v48, %v1464_v59  ;;  %v495_v12 = vmul.f32 %v1441_v48, %v1446_v49  ;;  %v1110_v59 = vmul.f32 %v1558_v7, %v1522_v36 }
  0xb9   : > { %433 = vrot.lane.b32.xlu1 %v426_v13, %s1341_s29  ;;  %v1569_v13 = vsel %vm963_vm10, %v995_v58, %v999_v62  ;;  %v1607_v62 = vmul.f32 %v1433_v42, %v1446_v49 }
  0xba   : > { %v505_v27 = vrot.slane %v493_v9, 1  ;;  %v506_v32 = vrot.slane %v495_v12, 1  ;;  %v536_v9 = vmul.f32 %v1433_v42, %v1466_v60  ;;  %v1631_v12 = vld [vmem:[%s1385_s21 + $0xf] ss:$0 sm:$0xff]  ;;  %v540_v60 = vmul.f32 %v1433_v42, %v1488_v11 }
  0xbb   : > { %v1576_v20 = vpop.permute.xlu1 %1060  ;;  %v1693_v42 = vld [vmem:[#allocation2 + $0x8] sm:$0xfc] }
  0xbc   : > { %v1571_v14 = vpop.permute.xlu0 %1018  ;;  %v1064_v39 = vmul.f32 %v1576_v20, %v1513_v29 }
  0xbd   : > { %v1022_v33 = vmul.f32 %v1571_v14, %v1513_v29  ;;  %v1024_v35 = vmul.f32 %v1571_v14, %v1435_v43  ;;  %v1026_v38 = vmul.f32 %v1571_v14, %v1522_v36  ;;  %v507_v29 = vsel %vm393_vm9, %v505_v27, %v506_v32  ;;  %v1638_v27 = vld [vmem:[#allocation2] sm:$0xf0] }
  0xbe   : > { %v1078_v57 = vrot.slane %v1064_v39, 4  ;;  %v1125_v39 = vrot.slane %v1110_v59, 4 }
  0xbf   : > { %v1036_v44 = vrot.slane %v1022_v33, 4  ;;  %v1041_v52 = vrot.slane %v1026_v38, 4  ;;  %v550_v38 = vrot.slane %v536_v9, 1 }
  0xc0   : > { %435 = vrot.lane.b32.xlu2 %v428_v40, %s1341_s29  ;;  %437 = vrot.lane.b32.xlu0 %v430_v41, %s1341_s29  ;;  %v1066_v40 = vmul.f32 %v1576_v20, %v1435_v43  ;;  %v511_v41 = vrot.slane %v497_v22, 1  ;;  %v548_v22 = vrot.slane %v1607_v62, 1 }
  0xc1   : > { %473 = vrot.lane.b32.xlu1 %v465_v51, %s1342_s30  ;;  %v1037_v51 = vrot.slane %v1024_v35, 4  ;;  %v1649_v35 = vmul.f32 %v1631_v12, %v1446_v49 }
  0xc2   : > { %v1079_v58 = vrot.slane %v1066_v40, 4  ;;  %v512_v48 = vsel %vm393_vm9, %v506_v32, %v511_v41  ;;  %v513_v32 = vrot.slane %v498_v63, 1  ;;  %v1653_v41 = vld [vmem:[#allocation2 + $0x20] sm:$0xf]  ;;  %v599_v63 = vmul.f32 %v1455_v54, %v1544_v53 }
  0xc3   : > { %v1615_v1 = vsel %vm963_vm10, %v1036_v44, %v1037_v51  ;;  %v1618_v4 = vsel %vm963_vm10, %v1037_v51, %v1041_v52  ;;  %v1068_v44 = vmul.f32 %v1576_v20, %v1522_v36  ;;  %v775_v11 = vrot.slane %v1649_v35, 3  ;;  %v1156_v35 = vld [vmem:[%s2051_s2 + $0x78] sm:$0xff] }
  0xc4   : > { %v1621_v46 = vsel %vm963_vm10, %v1078_v57, %v1079_v58  ;;  %v549_v51 = vsel %vm393_vm9, %v547_v25, %v548_v22  ;;  %v552_v52 = vsel %vm393_vm9, %v550_v38, %v551_v23  ;;  %v1662_v57 = vsel %vm963_vm10, %v1121_v18, %v1125_v39  ;;  %1161 = vmatpush.msra.mxu0 %v1156_v35 }
  0xc5   : > { %v514_v62 = vsel %vm393_vm9, %v509_v26, %v513_v32  ;;  %v1083_v0 = vrot.slane %v1068_v44, 4  ;;  %v555_v25 = vrot.slane %v540_v60, 1  ;;  %v611_v38 = vrot.slane %v599_v63, 2  ;;  %1269 = vmatpush.msra.mxu1 %v1156_v35 }
  0xc6   : > { %v600_v60 = vmul.f32 %v1455_v54, %v1693_v42 }
  0xc7   : > { %v1682_v9 = vsel %vm963_vm10, %v1079_v58, %v1083_v0  ;;  %v556_v44 = vsel %vm393_vm9, %v551_v23, %v555_v25 }
  0xc8   : > { %477 = vrot.lane.b32.xlu0 %v470_v16, %s1342_s30  ;;  %475 = vrot.lane.b32.xlu2 %v468_v17, %s1342_s30  ;;  %v1634_v16 = vld [vmem:[#allocation2 + $0x20] sm:$0x7]  ;;  %v1120_v17 = vrot.slane %v1106_v45, 4 }
  0xc9   : > { %479 = vrot.lane.b32.xlu1 %v472_v21, %s1342_s30  ;;  %v1326_v21 = vld [vmem:[%s1385_s21 + $0x14] ss:$0 sm:$0xff]  ;;  %v769_v40 = vmul.f32 %v1631_v12, %v1634_v16 }
  0xca   : > { %v1645_v33 = vsel %vm963_vm10, %v1120_v17, %v1121_v18  ;;  %v957_v45 = vmul.f32 %v1326_v21, %v1638_v27  ;;  %v958_v36 = vmul.f32 %v1326_v21, %v1446_v49  ;;  %v959_v26 = vmul.f32 %v1326_v21, %v1653_v41 }
  0xcb   : > { %v553_v21 = vrot.slane %v539_v8, 1 }
  0xcc   : > { %v964_v17 = vrot.slane %v957_v45, 4  ;;  %v965_v18 = vrot.slane %v958_v36, 4  ;;  %v967_v59 = vrot.slane %v959_v26, 4  ;;  %v602_v45 = vmul.f32 %v1455_v54, %v1435_v43 }
  0xcd   : > { %v554_v10 = vsel %vm393_vm9, %v548_v22, %v553_v21  ;;  %v642_v36 = vmul.f32 %v1458_v55, %v1693_v42 }
  0xce   : > { %v1685_v32 = vsel %vm963_vm10, %v964_v17, %v965_v18  ;;  %v615_v63 = vrot.slane %v602_v45, 2  ;;  %v643_v17 = vmul.f32 %v1458_v55, %v1446_v49 }
  0xd0   : > { %517 = vrot.lane.b32.xlu0 %v510_v61, %s1343_s5  ;;  %515 = vrot.lane.b32.xlu2 %v507_v29, %s1343_s5  ;;  %v777_v61 = vrot.slane %v769_v40, 3  ;;  %v601_v29 = vmul.f32 %v1455_v54, %v1446_v49  ;;  %v1688_v40 = vsel %vm963_vm10, %v965_v18, %v967_v59 }
  0xd1   : > { %519 = vrot.lane.b32.xlu1 %v512_v48, %s1343_s5 }
  0xd2   : > { %v1675_v48 = vsel %vm773_vm12, %v775_v11, %v777_v61  ;;  %v612_v39 = vrot.slane %v601_v29, 2  ;;  %v644_v29 = vmul.f32 %v1458_v55, %v1435_v43 }
  0xd4   : > { %v613_v23 = vsel %vm583_vm11, %v611_v38, %v612_v39  ;;  %v656_v38 = vrot.slane %v642_v36, 2 }
  0xd8   : > { %557 = vrot.lane.b32.xlu0 %v549_v51, %s1344_s6  ;;  %521 = vrot.lane.b32.xlu2 %v514_v62, %s1343_s5  ;;  %v1691_v51 = vld [vmem:[#allocation2 + $0x20] sm:$0x3]  ;;  %v614_v62 = vrot.slane %v600_v60, 2 }
  0xd9   : > { %559 = vrot.lane.b32.xlu1 %v552_v52, %s1344_s6  ;;  %v603_v58 = vmul.f32 %v1455_v54, %v1691_v51  ;;  %v1702_v52 = vld [vmem:[#allocation2 + $0x28] sm:$0x3]  ;;  %v645_v59 = vmul.f32 %v1458_v55, %v1691_v51 }
  0xda   : > { %v604_v22 = vmul.f32 %v1455_v54, %v1702_v52  ;;  %v616_v8 = vsel %vm583_vm11, %v614_v62, %v615_v63  ;;  %v641_v54 = vmul.f32 %v1458_v55, %v1544_v53  ;;  %v686_v62 = vmul.f32 %v1448_v50, %v1435_v43 }
  0xdb   : > { %v617_v61 = vrot.slane %v603_v58, 2  ;;  %v1727_v58 = vld [vmem:[%s1385_s21] ss:$0 sm:$0xff] }
  0xdc   : > { %v619_v0 = vrot.slane %v604_v22, 2  ;;  %v653_v21 = vrot.slane %v641_v54, 2  ;;  %v646_v22 = vmul.f32 %v1458_v55, %v1702_v52  ;;  %v261_v36 = vmul.f32 %v1727_v58, %v1420_v31 }
  0xdd   : > { %v618_v26 = vsel %vm583_vm11, %v612_v39, %v617_v61  ;;  %v657_v39 = vrot.slane %v644_v29, 2  ;;  %v684_v55 = vmul.f32 %v1448_v50, %v1693_v42 }
  0xde   : > { %v620_v18 = vsel %vm583_vm11, %v615_v63, %v619_v0  ;;  %v683_v63 = vmul.f32 %v1448_v50, %v1544_v53 }
  0xdf   : > { %v658_v60 = vsel %vm583_vm11, %v656_v38, %v657_v39 }
  0xe0   : > { %563 = vrot.lane.b32.xlu0 %v556_v44, %s1344_s6  ;;  %561 = vrot.lane.b32.xlu2 %v554_v10, %s1344_s6  ;;  %v654_v44 = vrot.slane %v643_v17, 2  ;;  %v659_v10 = vrot.slane %v645_v59, 2  ;;  %v699_v17 = vrot.slane %v686_v62, 2  ;;  %v698_v59 = vrot.slane %v684_v55, 2 }
  0xe1   : > { %621 = vrot.lane.b32.xlu1 %v613_v23, %s1341_s29  ;;  %v685_v23 = vmul.f32 %v1448_v50, %v1446_v49  ;;  %v730_v55 = vmul.f32 %v1480_v2, %v1702_v52 }
  0xe2   : > { %v655_v45 = vsel %vm583_vm11, %v653_v21, %v654_v44  ;;  %v660_v61 = vsel %vm583_vm11, %v654_v44, %v659_v10  ;;  %v687_v44 = vmul.f32 %v1448_v50, %v1691_v51  ;;  %v700_v31 = vsel %vm583_vm11, %v698_v59, %v699_v17 }
  0xe3   : > { %v727_v10 = vmul.f32 %v1480_v2, %v1446_v49 }
  0xe8   : > { %625 = vrot.lane.b32.xlu0 %v618_v26, %s1341_s29  ;;  %623 = vrot.lane.b32.xlu2 %v616_v8, %s1341_s29  ;;  %v696_v26 = vrot.slane %v685_v23, 2  ;;  %v661_v8 = vrot.slane %v646_v22, 2  ;;  %v738_v22 = vrot.slane %v727_v10, 2 }
  0xe9   : > { %627 = vrot.lane.b32.xlu1 %v620_v18, %s1341_s29  ;;  %v695_v18 = vrot.slane %v683_v63, 2 }
  0xea   : > { %v280_v25 = vpop.permute.xlu2 %279  ;;  %v662_v21 = vsel %vm583_vm11, %v657_v39, %v661_v8  ;;  %v688_v39 = vmul.f32 %v1448_v50, %v1702_v52  ;;  %v1785_v52 = vld [vmem:[#allocation2] sm:$0xf8] }
  0xeb   : > { %v697_v38 = vsel %vm583_vm11, %v695_v18, %v696_v26 }
  0xf0   : > { %665 = vrot.lane.b32.xlu0 %v658_v60, %s1342_s30  ;;  %663 = vrot.lane.b32.xlu2 %v655_v45, %s1342_s30  ;;  %v701_v45 = vrot.slane %v687_v44, 2  ;;  %v1779_v44 = vld [vmem:[#allocation2 + $0x8] sm:$0xf8] }
  0xf1   : > { %667 = vrot.lane.b32.xlu1 %v660_v61, %s1342_s30  ;;  %v703_v61 = vrot.slane %v688_v39, 2  ;;  %v789_v39 = vmul.f32 %v1483_v6, %v1785_v52 }
  0xf2   : > { %v282_v0 = vpop.permute.xlu2 %281  ;;  %v702_v62 = vsel %vm583_vm11, %v696_v26, %v701_v45 }
  0xf3   : > { %v288_v29 = vsel %vm287_vm13, %v280_v25, %v282_v0  ;;  %v725_v25 = vmul.f32 %v1480_v2, %v1544_v53  ;;  %v704_v63 = vsel %vm583_vm11, %v699_v17, %v703_v61  ;;  %v729_v53 = vmul.f32 %v1480_v2, %v1691_v51 }
  0xf4   : > { %v292_v54 = vadd.f32 %v288_v29, %v261_v36  ;;  %v726_v0 = vmul.f32 %v1480_v2, %v1693_v42  ;;  %v728_v36 = vmul.f32 %v1480_v2, %v1435_v43  ;;  %v792_v2 = vmul.f32 %v1483_v6, %v1435_v43 }
  0xf5   : > { %v737_v23 = vrot.slane %v725_v25, 2  ;;  %v743_v42 = vrot.slane %v729_v53, 2 }
  0xf6   : > { %v740_v17 = vrot.slane %v726_v0, 2  ;;  %v741_v18 = vrot.slane %v728_v36, 2  ;;  %v805_v0 = vrot.slane %v792_v2, 3  ;;  %v801_v36 = vrot.slane %v789_v39, 3 }
  0xf7   : > { %v739_v50 = vsel %vm583_vm11, %v737_v23, %v738_v22  ;;  %v744_v25 = vsel %vm583_vm11, %v738_v22, %v743_v42  ;;  %v793_v23 = vmul.f32 %v1483_v6, %v1634_v16 }
  0xf8   : > { %705 = vrot.lane.b32.xlu0 %v697_v38, %s1343_s5  ;;  %669 = vrot.lane.b32.xlu2 %v662_v21, %s1342_s30  ;;  %v745_v38 = vrot.slane %v730_v55, 2  ;;  %v742_v10 = vsel %vm583_vm11, %v740_v17, %v741_v18 }
  0xf9   : > { %707 = vrot.lane.b32.xlu1 %v700_v31, %s1343_s5  ;;  %v790_v31 = vmul.f32 %v1483_v6, %v1779_v44 }
  0xfa   : > { %v338_v60 = vpop.permute.xlu2 %337  ;;  %v746_v45 = vsel %vm583_vm11, %v741_v18, %v745_v38  ;;  %v833_v18 = vmul.f32 %v1460_v56, %v1446_v49  ;;  %v834_v38 = vmul.f32 %v1460_v56, %v1435_v43 }
  0xfc   : > { %v844_v39 = vrot.slane %v833_v18, 3 }
 0x100   : > { %711 = vrot.lane.b32.xlu0 %v704_v63, %s1343_s5  ;;  %709 = vrot.lane.b32.xlu2 %v702_v62, %s1343_s5  ;;  %v804_v62 = vrot.slane %v790_v31, 3 }
 0x101   : > { %747 = vrot.lane.b32.xlu1 %v739_v50, %s1344_s6 }
 0x102   : > { %v1776_v29 = vpop.permute.xlu2 %312  ;;  %v309_v26 = vpop.permute.xlu0 %308  ;;  %v806_v42 = vsel %vm773_vm12, %v804_v62, %v805_v0 }
 0x103   : > { %v311_v8 = vpop.permute.xlu1 %310 }
 0x104   : > { %v317_v59 = vsel %vm316_vm14, %v309_v26, %v311_v8  ;;  %v807_v26 = vrot.slane %v793_v23, 3  ;;  %v1800_v8 = vld [vmem:[#allocation2 + $0x28] sm:$0x7]  ;;  %v847_v23 = vrot.slane %v834_v38, 3 }
 0x105   : > { %v321_v21 = vadd.f32 %v317_v59, %v292_v54  ;;  %v791_v54 = vmul.f32 %v1483_v6, %v1446_v49  ;;  %v794_v59 = vmul.f32 %v1483_v6, %v1800_v8  ;;  %v832_v6 = vmul.f32 %v1460_v56, %v1779_v44 }
 0x107   : > { %v802_v50 = vrot.slane %v791_v54, 3  ;;  %v809_v54 = vrot.slane %v794_v59, 3  ;;  %v846_v62 = vrot.slane %v832_v6, 3 }
 0x108   : > { %751 = vrot.lane.b32.xlu0 %v744_v25, %s1344_s6  ;;  %749 = vrot.lane.b32.xlu2 %v742_v10, %s1344_s6 }
 0x109   : > { %753 = vrot.lane.b32.xlu1 %v746_v45, %s1344_s6  ;;  %v803_v17 = vsel %vm773_vm12, %v801_v36, %v802_v50 }
 0x10a   : > { %v344_v22 = vpop.permute.xlu2 %343  ;;  %v340_v61 = vpop.permute.xlu0 %339 }
 0x10b   : > { %v367_v63 = vpop.permute.xlu1 %366  ;;  %v346_v53 = vsel %vm345_vm15, %v338_v60, %v340_v61  ;;  %v808_v60 = vsel %vm773_vm12, %v802_v50, %v807_v26  ;;  %v810_v50 = vsel %vm773_vm12, %v805_v0, %v809_v54  ;;  %v836_v26 = vmul.f32 %v1460_v56, %v1800_v8 }
 0x10c   : > { %v350_v55 = vadd.f32 %v346_v53, %v321_v21  ;;  %v831_v21 = vmul.f32 %v1460_v56, %v1785_v52  ;;  %v835_v0 = vmul.f32 %v1460_v56, %v1634_v16  ;;  %v874_v56 = vmul.f32 %v1515_v30, %v1779_v44 }
 0x10d   : > { %v851_v38 = vrot.slane %v836_v26, 3 }
 0x10e   : > { %v843_v61 = vrot.slane %v831_v21, 3  ;;  %v849_v6 = vrot.slane %v835_v0, 3 }
 0x110   : > { %813 = vrot.lane.b32.xlu0 %v806_v42, %s1341_s29  ;;  %811 = vrot.lane.b32.xlu2 %v803_v17, %s1341_s29  ;;  %v845_v36 = vsel %vm773_vm12, %v843_v61, %v844_v39  ;;  %v850_v54 = vsel %vm773_vm12, %v844_v39, %v849_v6  ;;  %v876_v61 = vmul.f32 %v1515_v30, %v1435_v43 }
 0x111   : > { %815 = vrot.lane.b32.xlu1 %v808_v60, %s1341_s29  ;;  %v878_v39 = vmul.f32 %v1515_v30, %v1800_v8  ;;  %v917_v6 = vmul.f32 %v1524_v37, %v1446_v49 }
 0x112   : > { %v373_v31 = vpop.permute.xlu2 %372  ;;  %v369_v2 = vpop.permute.xlu0 %368 }
 0x113   : > { %v286_v25 = vpop.permute.xlu1 %285  ;;  %v375_v10 = vsel %vm374_vm0, %v367_v63, %v369_v2  ;;  %v848_v63 = vsel %vm773_vm12, %v846_v62, %v847_v23 }
 0x114   : > { %v379_v45 = vadd.f32 %v375_v10, %v350_v55  ;;  %v873_v55 = vmul.f32 %v1515_v30, %v1785_v52  ;;  %v852_v10 = vsel %vm773_vm12, %v847_v23, %v851_v38 }
 0x116   : > { %v1820_v53 = vadd.f32 %v1511_v28, %v379_v45  ;;  %v875_v28 = vmul.f32 %v1515_v30, %v1446_v49  ;;  %v885_v21 = vrot.slane %v873_v55, 3  ;;  %v877_v45 = vmul.f32 %v1515_v30, %v1634_v16 }
 0x117   : > { %v889_v55 = vrot.slane %v876_v61, 3  ;;  %v916_v30 = vmul.f32 %v1524_v37, %v1779_v44  ;;  %v919_v44 = vmul.f32 %v1524_v37, %v1634_v16  ;;  %v979_v16 = vmul.f32 %v1493_v15, %v1638_v27 }
 0x118   : > { %853 = vrot.lane.b32.xlu0 %v845_v36, %s1342_s30  ;;  %817 = vrot.lane.b32.xlu2 %v810_v50, %s1341_s29  ;;  %v886_v2 = vrot.slane %v875_v28, 3 }
 0x119   : > { %855 = vrot.lane.b32.xlu1 %v848_v63, %s1342_s30  ;;  %v891_v63 = vrot.slane %v877_v45, 3  ;;  %v930_v45 = vrot.slane %v916_v30, 3 }
 0x11a   : > { %v1836_v42 = vpop.permute.xlu2 %435  ;;  %v284_v17 = vpop.permute.xlu0 %283 }
 0x11b   : > { %v342_v18 = vpop.permute.xlu1 %341  ;;  %v289_v59 = vsel %vm287_vm13, %v284_v17, %v286_v25  ;;  %v887_v25 = vsel %vm773_vm12, %v885_v21, %v886_v2  ;;  %v893_v17 = vrot.slane %v878_v39, 3  ;;  %v892_v38 = vsel %vm773_vm12, %v886_v2, %v891_v63 }
 0x11c   : > { %v347_v60 = vsel %vm345_vm15, %v342_v18, %v344_v22  ;;  %v262_v22 = vmul.f32 %v1727_v58, %v1446_v49  ;;  %v888_v58 = vrot.slane %v874_v56, 3  ;;  %v933_v39 = vrot.slane %v919_v44, 3 }
 0x11e   : > { %v293_v23 = vadd.f32 %v289_v59, %v262_v22  ;;  %v918_v59 = vmul.f32 %v1524_v37, %v1435_v43  ;;  %v890_v21 = vsel %vm773_vm12, %v888_v58, %v889_v55  ;;  %v928_v22 = vrot.slane %v917_v6, 3 }
 0x120   : > { %859 = vrot.lane.b32.xlu0 %v852_v10, %s1342_s30  ;;  %857 = vrot.lane.b32.xlu2 %v850_v54, %s1342_s30  ;;  %v931_v56 = vrot.slane %v918_v59, 3  ;;  %v934_v63 = vsel %vm773_vm12, %v928_v22, %v933_v39 }
 0x121   : > { %895 = vrot.lane.b32.xlu1 %v887_v25, %s1343_s5 }
 0x122   : > { %v476_v62 = vpop.permute.xlu2 %475  ;;  %v315_v36 = vpop.permute.xlu0 %314 }
 0x123   : > { %v371_v50 = vpop.permute.xlu1 %370  ;;  %v318_v26 = vsel %vm316_vm14, %v1776_v29, %v315_v36  ;;  %v915_v29 = vmul.f32 %v1524_v37, %v1785_v52  ;;  %v932_v36 = vsel %vm773_vm12, %v930_v45, %v931_v56  ;;  %v1025_v45 = vmul.f32 %v1571_v14, %v1653_v41 }
 0x124   : > { %v376_v28 = vsel %vm374_vm0, %v371_v50, %v373_v31  ;;  %v322_v0 = vadd.f32 %v318_v26, %v293_v23  ;;  %v894_v31 = vsel %vm773_vm12, %v889_v55, %v893_v17  ;;  %v920_v26 = vmul.f32 %v1524_v37, %v1800_v8 }
 0x125   : > { %v927_v61 = vrot.slane %v915_v29, 3  ;;  %v1023_v29 = vmul.f32 %v1571_v14, %v1446_v49  ;;  %v1039_v39 = vrot.slane %v1025_v45, 4 }
 0x126   : > { %v351_v18 = vadd.f32 %v347_v60, %v322_v0  ;;  %v991_v0 = vrot.slane %v979_v16, 4 }
 0x127   : > { %v929_v50 = vsel %vm773_vm12, %v927_v61, %v928_v22 }
 0x128   : > { %899 = vrot.lane.b32.xlu0 %v892_v38, %s1343_s5  ;;  %897 = vrot.lane.b32.xlu2 %v890_v21, %s1343_s5  ;;  %v380_v43 = vadd.f32 %v376_v28, %v351_v18  ;;  %v935_v18 = vrot.slane %v920_v26, 3  ;;  %v983_v21 = vmul.f32 %v1493_v15, %v1653_v41 }
 0x129   : > { %901 = vrot.lane.b32.xlu1 %v894_v31, %s1343_s5 }
 0x12a   : > { %v516_v60 = vpop.permute.xlu2 %515  ;;  %v432_v2 = vpop.permute.xlu0 %431  ;;  %v402_v10 = vadd.f32 %v1518_v34, %v380_v43  ;;  %v981_v34 = vmul.f32 %v1493_v15, %v1446_v49  ;;  %v936_v38 = vsel %vm773_vm12, %v931_v56, %v935_v18  ;;  %v997_v44 = vrot.slane %v983_v21, 4 }
 0x12b   : > { %v434_v54 = vpop.permute.xlu1 %433 }
 0x12c   : > { %v439_v25 = vsel %vm287_vm13, %v432_v2, %v434_v54  ;;  %v992_v17 = vrot.slane %v981_v34, 4  ;;  %v1034_v2 = vrot.slane %v1023_v29, 4 }
 0x12d   : > { %v443_v23 = vadd.f32 %v439_v25, %v1820_v53 }
 0x12e   : > { %v993_v59 = vsel %vm963_vm10, %v991_v0, %v992_v17  ;;  %v998_v54 = vsel %vm963_vm10, %v992_v17, %v997_v44  ;;  %v1105_v17 = vmul.f32 %v1558_v7, %v1638_v27 }
 0x130   : > { %939 = vrot.lane.b32.xlu0 %v932_v36, %s1344_s6  ;;  %937 = vrot.lane.b32.xlu2 %v929_v50, %s1344_s6  ;;  %v1065_v50 = vmul.f32 %v1576_v20, %v1446_v49 }
 0x131   : > { %941 = vrot.lane.b32.xlu1 %v934_v63, %s1344_s6 }
 0x132   : > { %v522_v53 = vpop.permute.xlu2 %521  ;;  %v438_v58 = vpop.permute.xlu0 %437 }
 0x133   : > { %v474_v55 = vpop.permute.xlu1 %473  ;;  %v440_v28 = vsel %vm287_vm13, %v1836_v42, %v438_v58  ;;  %v1021_v42 = vmul.f32 %v1571_v14, %v1638_v27  ;;  %v1040_v14 = vsel %vm963_vm10, %v1034_v2, %v1039_v39  ;;  %v1076_v58 = vrot.slane %v1065_v50, 4 }
 0x134   : > { %v481_v30 = vsel %vm316_vm14, %v474_v55, %v476_v62  ;;  %v444_v37 = vadd.f32 %v440_v28, %v402_v10 }
 0x135   : > { %v485_v8 = vadd.f32 %v481_v30, %v443_v23  ;;  %v1033_v15 = vrot.slane %v1021_v42, 4 }
 0x138   : > { %1001 = vrot.lane.b32.xlu0 %v993_v59, %s1341_s29  ;;  %943 = vrot.lane.b32.xlu2 %v936_v38, %s1344_s6  ;;  %v1117_v59 = vrot.slane %v1105_v17, 4 }
 0x139   : > { %1003 = vrot.lane.b32.xlu1 %v1556_v5, %s1341_s29  ;;  %v1035_v5 = vsel %vm963_vm10, %v1033_v15, %v1034_v2 }
 0x13a   : > { %v562_v62 = vpop.permute.xlu2 %561  ;;  %v478_v6 = vpop.permute.xlu0 %477 }
 0x13b   : > { %v480_v31 = vpop.permute.xlu1 %479 }
 0x13c   : > { %v482_v43 = vsel %vm316_vm14, %v478_v6, %v480_v31  ;;  %v1109_v6 = vmul.f32 %v1558_v7, %v1653_v41 }
 0x13d   : > { %v486_v10 = vadd.f32 %v482_v43, %v444_v37 }
 0x13e   : > { %v1123_v3 = vrot.slane %v1109_v6, 4  ;;  %v1148_v6 = vld [vmem:[%s2051_s2 + $0x38] sm:$0xff] }
 0x140   : > { %1007 = vrot.lane.b32.xlu0 %v1569_v13, %s1341_s29  ;;  %1005 = vrot.lane.b32.xlu2 %v998_v54, %s1341_s29  ;;  %v1063_v13 = vmul.f32 %v1576_v20, %v1638_v27 }
 0x141   : > { %1043 = vrot.lane.b32.xlu1 %v1035_v5, %s1342_s30 }
 0x142   : > { %v624_v56 = vpop.permute.xlu2 %623  ;;  %v518_v61 = vpop.permute.xlu0 %517 }
 0x143   : > { %v520_v22 = vpop.permute.xlu1 %519  ;;  %v523_v25 = vsel %vm345_vm15, %v516_v60, %v518_v61  ;;  %v1067_v60 = vmul.f32 %v1576_v20, %v1653_v41  ;;  %v1107_v20 = vmul.f32 %v1558_v7, %v1446_v49 }
 0x144   : > { %v524_v23 = vsel %vm345_vm15, %v520_v22, %v522_v53  ;;  %v527_v16 = vadd.f32 %v523_v25, %v485_v8  ;;  %v1075_v53 = vrot.slane %v1063_v13, 4 }
 0x145   : > { %v528_v36 = vadd.f32 %v524_v23, %v486_v10  ;;  %v1081_v28 = vrot.slane %v1067_v60, 4  ;;  %v1118_v38 = vrot.slane %v1107_v20, 4  ;;  %v1154_v20 = vld [vmem:[%s2051_s2 + $0x68] sm:$0xff] }
 0x147   : > { %v1082_v30 = vsel %vm963_vm10, %v1076_v58, %v1081_v28  ;;  %v1119_v29 = vsel %vm963_vm10, %v1117_v59, %v1118_v38  ;;  %v1124_v15 = vsel %vm963_vm10, %v1118_v38, %v1123_v3 }
 0x148   : > { %1047 = vrot.lane.b32.xlu0 %v1040_v14, %s1342_s30  ;;  %1045 = vrot.lane.b32.xlu2 %v1615_v1, %s1342_s30  ;;  %v1077_v1 = vsel %vm963_vm10, %v1075_v53, %v1076_v58 }
 0x149   : > { %1049 = vrot.lane.b32.xlu1 %v1618_v4, %s1342_s30  ;;  %v579_v4 = vmul.f32 %v1537_v47, %v1691_v51 }
 0x14a   : > { %v664_v34 = vpop.permute.xlu2 %663  ;;  %v558_v26 = vpop.permute.xlu0 %557 }
 0x14b   : > { %v560_v63 = vpop.permute.xlu1 %559  ;;  %v587_v49 = vrot.slane %v579_v4, 2  ;;  %v1153_v4 = vld [vmem:[%s2051_s2 + $0x60] sm:$0xff] }
 0x14c   : > { %v565_v55 = vsel %vm374_vm0, %v558_v26, %v560_v63 }
 0x14d   : > { %v569_v0 = vadd.f32 %v565_v55, %v527_v16 }
 0x14f   : > { %v591_v18 = vadd.f32 %v1587_v24, %v569_v0 }
 0x150   : > { %1087 = vrot.lane.b32.xlu0 %v1621_v46, %s1343_s5  ;;  %1085 = vrot.lane.b32.xlu2 %v1077_v1, %s1343_s5  ;;  %v588_v46 = vsel %vm583_vm11, %v585_v19, %v587_v49 }
 0x151   : > { %1089 = vrot.lane.b32.xlu1 %v1082_v30, %s1343_s5 }
 0x152   : > { %v670_v27 = vpop.permute.xlu2 %669  ;;  %v564_v37 = vpop.permute.xlu0 %563 }
 0x153   : > { %v622_v8 = vpop.permute.xlu1 %621  ;;  %v566_v24 = vsel %vm374_vm0, %v562_v62, %v564_v37  ;;  %v1151_v37 = vld [vmem:[%s2051_s2 + $0x50] sm:$0xff] }
 0x154   : > { %v629_v21 = vsel %vm287_vm13, %v622_v8, %v624_v56  ;;  %v570_v47 = vadd.f32 %v566_v24, %v528_v36 }
 0x155   : > { %v633_v51 = vadd.f32 %v629_v21, %v591_v18  ;;  %v1150_v21 = vld [vmem:[%s2051_s2 + $0x48] sm:$0xff] }
 0x156   : > { %v592_v42 = vadd.f32 %v588_v46, %v570_v47  ;;  %v1149_v47 = vld [vmem:[%s2051_s2 + $0x40] sm:$0xff] }
 0x158   : > { %1127 = vrot.lane.b32.xlu0 %v1119_v29, %s1344_s6  ;;  %1091 = vrot.lane.b32.xlu2 %v1682_v9, %s1343_s5 }
 0x159   : > { %1129 = vrot.lane.b32.xlu1 %v1645_v33, %s1344_s6 }
 0x15a   : > { %v710_v62 = vpop.permute.xlu2 %709  ;;  %v626_v31 = vpop.permute.xlu0 %625 }
 0x15b   : > { %v628_v44 = vpop.permute.xlu1 %627 }
 0x15c   : > { %v630_v19 = vsel %vm287_vm13, %v626_v31, %v628_v44 }
 0x15d   : > { %v634_v43 = vadd.f32 %v630_v19, %v592_v42  ;;  %v1147_v19 = vld [vmem:[%s2051_s2 + $0x30] sm:$0xff] }
 0x160   : > { %1133 = vrot.lane.b32.xlu0 %v1662_v57, %s1344_s6  ;;  %1131 = vrot.lane.b32.xlu2 %v1124_v15, %s1344_s6  ;;  %v767_v57 = vmul.f32 %v1631_v12, %v1785_v52 }
 0x162   : > { %v666_v7 = vpop.permute.xlu0 %665  ;;  %v750_v2 = vpop.permute.xlu2 %749  ;;  %v774_v14 = vrot.slane %v767_v57, 3 }
 0x163   : > { %v668_v41 = vpop.permute.xlu1 %667  ;;  %v671_v9 = vsel %vm316_vm14, %v664_v34, %v666_v7 }
 0x164   : > { %v672_v33 = vsel %vm316_vm14, %v668_v41, %v670_v27  ;;  %v675_v10 = vadd.f32 %v671_v9, %v633_v51  ;;  %v776_v50 = vsel %vm773_vm12, %v774_v14, %v775_v11  ;;  %v1155_v11 = vld [vmem:[%s2051_s2 + $0x70] sm:$0xff]  ;;  %v1152_v27 = vld [vmem:[%s2051_s2 + $0x58] sm:$0xff] }
 0x165   : > { %v676_v54 = vadd.f32 %v672_v33, %v634_v43  ;;  %1162 = vmatpush.msra.mxu0 %v1155_v11  ;;  %1270 = vmatpush.msra.mxu1 %v1155_v11 }
 0x167   : > { %1163 = vmatpush.msra.mxu0 %v1154_v20  ;;  %1271 = vmatpush.msra.mxu1 %v1154_v20 }
 0x169   : > { %1164 = vmatpush.msra.mxu0 %v1153_v4  ;;  %1272 = vmatpush.msra.mxu1 %v1153_v4 }
 0x16a   : > { %v706_v45 = vpop.permute.xlu0 %705  ;;  %v812_v22 = vpop.permute.xlu2 %811 }
 0x16b   : > { %v708_v5 = vpop.permute.xlu1 %707  ;;  %1165 = vmatpush.msra.mxu0 %v1152_v27  ;;  %1273 = vmatpush.msra.mxu1 %v1152_v27 }
 0x16c   : > { %v713_v56 = vsel %vm345_vm15, %v706_v45, %v708_v5  ;;  %v1145_v45 = vld [vmem:[%s2051_s2 + $0x20] sm:$0xff] }
 0x16d   : > { %v717_v61 = vadd.f32 %v713_v56, %v675_v10  ;;  %1166 = vmatpush.msra.mxu0 %v1151_v37  ;;  %1274 = vmatpush.msra.mxu1 %v1151_v37 }
 0x16f   : > { %1167 = vmatpush.msra.mxu0 %v1150_v21  ;;  %1275 = vmatpush.msra.mxu1 %v1150_v21 }
 0x171   : > { %1168 = vmatpush.msra.mxu0 %v1149_v47  ;;  %1276 = vmatpush.msra.mxu1 %v1149_v47 }
 0x172   : > { %v712_v25 = vpop.permute.xlu0 %711  ;;  %v818_v34 = vpop.permute.xlu2 %817 }
 0x173   : > { %v748_v39 = vpop.permute.xlu1 %747  ;;  %v714_v23 = vsel %vm345_vm15, %v710_v62, %v712_v25  ;;  %1169 = vmatpush.msra.mxu0 %v1148_v6  ;;  %1277 = vmatpush.msra.mxu1 %v1148_v6 }
 0x174   : > { %v755_v16 = vsel %vm374_vm0, %v748_v39, %v750_v2  ;;  %v718_v36 = vadd.f32 %v714_v23, %v676_v54  ;;  %v1146_v54 = vld [vmem:[%s2051_s2 + $0x28] sm:$0xff] }
 0x175   : > { %v759_v13 = vadd.f32 %v755_v16, %v717_v61  ;;  %1170 = vmatpush.msra.mxu0 %v1147_v19  ;;  %1278 = vmatpush.msra.mxu1 %v1147_v19  ;;  %v1144_v61 = vld [vmem:[%s2051_s2 + $0x18] sm:$0xff] }
 0x177   : > { %v781_v60 = vadd.f32 %v776_v50, %v759_v13  ;;  %1171 = vmatpush.msra.mxu0 %v1146_v54  ;;  %1279 = vmatpush.msra.mxu1 %v1146_v54 }
 0x179   : > { %1172 = vmatpush.msra.mxu0 %v1145_v45  ;;  %1280 = vmatpush.msra.mxu1 %v1145_v45 }
 0x17a   : > { %v752_v26 = vpop.permute.xlu0 %751  ;;  %v858_v58 = vpop.permute.xlu2 %857 }
 0x17b   : > { %v754_v63 = vpop.permute.xlu1 %753  ;;  %1173 = vmatpush.msra.mxu0 %v1144_v61  ;;  %1281 = vmatpush.msra.mxu1 %v1144_v61 }
 0x17c   : > { %v756_v53 = vsel %vm374_vm0, %v752_v26, %v754_v63 }
 0x17d   : > { %v760_v12 = vadd.f32 %v756_v53, %v718_v36 }
 0x17f   : > { %v782_v52 = vadd.f32 %v1675_v48, %v760_v12 }
 0x182   : > { %v814_v55 = vpop.permute.xlu0 %813  ;;  %v898_v1 = vpop.permute.xlu2 %897 }
 0x183   : > { %v816_v28 = vpop.permute.xlu1 %815  ;;  %v819_v24 = vsel %vm287_vm13, %v812_v22, %v814_v55  ;;  %v1143_v22 = vld [vmem:[%s2051_s2 + $0x10] sm:$0xff] }
 0x184   : > { %v820_v38 = vsel %vm287_vm13, %v816_v28, %v818_v34  ;;  %v823_v51 = vadd.f32 %v819_v24, %v781_v60  ;;  %1174 = vmatpush.msra.mxu0 %v1143_v22  ;;  %1282 = vmatpush.msra.mxu1 %v1143_v22  ;;  %v1327_v24 = vld [vmem:[%s2052_s3] ss:$0 sm:$0xff] }
 0x185   : > { %v824_v42 = vadd.f32 %v820_v38, %v782_v52 }
 0x18a   : > { %v854_v0 = vpop.permute.xlu0 %853  ;;  %v938_v30 = vpop.permute.xlu2 %937 }
 0x18b   : > { %v856_v17 = vpop.permute.xlu1 %855 }
 0x18c   : > { %v861_v49 = vsel %vm316_vm14, %v854_v0, %v856_v17 }
 0x18d   : > { %v865_v62 = vadd.f32 %v861_v49, %v823_v51 }
 0x192   : > { %v860_v18 = vpop.permute.xlu0 %859  ;;  %v944_v31 = vpop.permute.xlu2 %943 }
 0x193   : > { %v896_v48 = vpop.permute.xlu1 %895  ;;  %v862_v46 = vsel %vm316_vm14, %v858_v58, %v860_v18 }
 0x194   : > { %v903_v29 = vsel %vm345_vm15, %v896_v48, %v898_v1  ;;  %v866_v3 = vadd.f32 %v862_v46, %v824_v42 }
 0x195   : > { %v907_v43 = vadd.f32 %v903_v29, %v865_v62 }
 0x19a   : > { %v900_v8 = vpop.permute.xlu0 %899  ;;  %v1006_v57 = vpop.permute.xlu2 %1005 }
 0x19b   : > { %v902_v59 = vpop.permute.xlu1 %901 }
 0x19c   : > { %v904_v44 = vsel %vm345_vm15, %v900_v8, %v902_v59 }
 0x19d   : > { %v908_v7 = vadd.f32 %v904_v44, %v866_v3 }
 0x1a2   : > { %v940_v15 = vpop.permute.xlu0 %939  ;;  %v1046_v36 = vpop.permute.xlu2 %1045 }
 0x1a3   : > { %v942_v41 = vpop.permute.xlu1 %941  ;;  %v945_v9 = vsel %vm374_vm0, %v938_v30, %v940_v15 }
 0x1a4   : > { %v946_v33 = vsel %vm374_vm0, %v942_v41, %v944_v31  ;;  %v949_v2 = vadd.f32 %v945_v9, %v907_v43 }
 0x1a5   : > { %v950_v10 = vadd.f32 %v946_v33, %v908_v7 }
 0x1a6   : > { %v971_v5 = vadd.f32 %v1685_v32, %v949_v2  ;;  %v1142_v32 = vld [vmem:[%s2051_s2 + $0x8] sm:$0xff] }
 0x1a7   : > { %v972_v56 = vadd.f32 %v1688_v40, %v950_v10  ;;  %v1141_v40 = vld [vmem:[%s2051_s2] sm:$0xff]  ;;  %1175 = vmatpush.msra.mxu0 %v1142_v32  ;;  %1283 = vmatpush.msra.mxu1 %v1142_v32 }
 0x1a9   : > { %1176 = vmatpush.msra.mxu0 %v1141_v40  ;;  %1284 = vmatpush.msra.mxu1 %v1141_v40 }
 0x1aa   : > { %v1002_v25 = vpop.permute.xlu0 %1001  ;;  %v1086_v50 = vpop.permute.xlu2 %1085 }
 0x1ab   : > { %v1004_v39 = vpop.permute.xlu1 %1003 }
 0x1ac   : > { %v1009_v26 = vsel %vm287_vm13, %v1002_v25, %v1004_v39 }
 0x1ad   : > { %v1013_v53 = vadd.f32 %v1009_v26, %v971_v5 }
 0x1b2   : > { %v1008_v23 = vpop.permute.xlu0 %1007  ;;  %v1092_v12 = vpop.permute.xlu2 %1091 }
 0x1b3   : > { %v1044_v16 = vpop.permute.xlu1 %1043  ;;  %v1010_v28 = vsel %vm287_vm13, %v1006_v57, %v1008_v23 }
 0x1b4   : > { %v1051_v63 = vsel %vm316_vm14, %v1044_v16, %v1046_v36  ;;  %v1014_v18 = vadd.f32 %v1010_v28, %v972_v56 }
 0x1b5   : > { %v1055_v58 = vadd.f32 %v1051_v63, %v1013_v53 }
 0x1ba   : > { %v1048_v14 = vpop.permute.xlu0 %1047  ;;  %v1132_v4 = vpop.permute.xlu2 %1131 }
 0x1bb   : > { %v1050_v13 = vpop.permute.xlu1 %1049 }
 0x1bc   : > { %v1052_v35 = vsel %vm316_vm14, %v1048_v14, %v1050_v13 }
 0x1bd   : > { %v1056_v20 = vadd.f32 %v1052_v35, %v1014_v18 }
 0x1c2   : > { %v1088_v60 = vpop.permute.xlu0 %1087 }
 0x1c3   : > { %v1090_v34 = vpop.permute.xlu1 %1089  ;;  %v1093_v52 = vsel %vm345_vm15, %v1086_v50, %v1088_v60 }
 0x1c4   : > { %v1097_v0 = vadd.f32 %v1093_v52, %v1055_v58  ;;  %v1094_v48 = vsel %vm345_vm15, %v1090_v34, %v1092_v12 }
 0x1c5   : > { %v1098_v30 = vadd.f32 %v1094_v48, %v1056_v20 }
 0x1ca   : > { %v1128_v55 = vpop.permute.xlu0 %1127 }
 0x1cb   : > { %v1130_v17 = vpop.permute.xlu1 %1129 }
 0x1cc   : > { %v1135_v1 = vsel %vm374_vm0, %v1128_v55, %v1130_v17 }
 0x1cd   : > { %v1139_v11 = vadd.f32 %v1135_v1, %v1097_v0 }
 0x1cf   : > { %1177 = vmatmul.f32.vlgmr.msra.gmra.mxu0 %v1139_v11 }
 0x1d2   : > { %v1134_v27 = vpop.permute.xlu0 %1133 }
 0x1d3   : > { %v1136_v37 = vsel %vm374_vm0, %v1132_v4, %v1134_v27 }
 0x1d4   : > { %v1140_v8 = vadd.f32 %v1136_v37, %v1098_v30 }
 0x1d6   : > { %1180 = vmatmul.f32.vlgmr.msra.gmra.mxu1 %v1140_v8 }
 0x24c   : > { %v1178_v59 = vpop.f32.mrf.mxu0 }
 0x24d   : > { %v1179_v38 = vadd.f32 %v1327_v24, %v1178_v59 }
 0x24f   : > { %1184 = vst [vmem:[%s217_s23] sm:$0xff] %v1179_v38 }
 0x253   : > { %v1181_v49 = vpop.f32.mrf.mxu1 }
 0x254   : > { %v1182_v21 = vadd.f32 %v1327_v24, %v1181_v49 }
 0x256   : > { %1185 = vst [vmem:[%s217_s23 + $0x8] sm:$0xff] %v1182_v21 }
 0x257 PF: > { %s14_s15 = sadd.s32 1, %s1334_s15  }
 0x258   : > { %p11_p4 = scmp.ge.s32.totalorder %s14_s15, 4  }
 0x25a   :  { %13 = sbr.rel (!%p11_p4) target bundleno = 1 (0x1), region = 69 }

</bundles_post_ra>
